<compile_context>
chip_gen: v7x
topology: tpu7x:2x2x1
jax: 0.10.0
libtpu: 0.0.40
codegen_flags: <defaults>
</compile_context>

<pallas_src>
import functools

import jax
import jax.numpy as jnp
from jax import lax
from jax.experimental import pallas as pl
from jax.experimental.pallas import tpu as pltpu


def _round_up(n, m):
    return ((n + m - 1) // m) * m


def _supports_bf16_act():
    """True on TPU generations with bf16 EUP/VPU (v6e / v7x); False on v5e etc."""
    try:
        kind = jax.devices()[0].device_kind.lower()
    except Exception:
        return False
    return any(tag in kind for tag in ("v6", "v7", "7x"))


def _hedge_mlp_kernel(x_ref, w1_ref, w2_ref, w3_ref, aux_ref, o_ref, *, act_dtype):
    """Fused 4-layer MLP on one batch tile; hidden layers keep batch on lanes.

    aux_ref columns: [b1, b2, b3, w4_row, b4 (value stored at row 0)].
    """
    f32 = jnp.float32
    mm_dtype = w2_ref.dtype                      # matmul input dtype (bf16/f32)

    b1 = aux_ref[:, 0:1]
    b2 = aux_ref[:, 1:2]
    b3 = aux_ref[:, 2:3]
    w4 = aux_ref[:, 3:4]
    b4 = aux_ref[0:1, 4:5]

    def sigmoid(z, out_dtype):
        # sigmoid(z) = 0.5*(tanh(z/2)+1): a single EUP op; tanh optionally bf16.
        t = jnp.tanh((0.5 * z).astype(act_dtype))
        return (0.5 * (t.astype(f32) + 1.0)).astype(out_dtype)

    # Layer 1 (tiny K = in_dim): keep f32 and contract x's feature axis directly
    # (rhs-transposed dot), so x enters in natural (batch, in_dim) layout.
    x = x_ref[...]                                               # (bb, in_dim) f32
    z1 = lax.dot_general(w1_ref[...], x, (((1,), (1,)), ((), ())),
                         preferred_element_type=f32)             # (256, bb)
    h = sigmoid(z1 + b1, mm_dtype)                               # single store/copy

    z2 = jnp.dot(w2_ref[...], h, preferred_element_type=f32) + b2
    h = sigmoid(z2, mm_dtype)

    z3 = jnp.dot(w3_ref[...], h, preferred_element_type=f32) + b3
    h = sigmoid(z3, f32)                                         # consumer is VPU

    # Final 256 -> 1: VPU broadcast-mul + sublane (XLU) reduce -> lane-dense row.
    logit = jnp.sum(w4 * h, axis=0, keepdims=True) + b4          # (1, bb) f32
    o_ref[...] = (0.5 * (jnp.tanh(0.5 * logit) + 1.0)).astype(o_ref.dtype)


@functools.partial(jax.jit, static_argnames=("block_b", "use_bf16", "bf16_act"))
def hedge_mlp_forward(x, params, *, block_b=512, use_bf16=True, bf16_act=None):
    """HedgeMLP forward via pallas_call.

    x: (B, input_dim) float32.  params in PyTorch layout:
       (w1 (256,in), b1 (256,), w2 (256,256), b2, w3 (256,256), b3,
        w4 (1,256),  b4 (1,)).
    Returns (B,) float32 (matches .squeeze(-1)).

    use_bf16=True (default): bf16 MXU inputs for layers 2-3, f32 accumulation.
    use_bf16=False: fully f32 (bit-level PyTorch-like semantics).
    bf16_act: bf16 tanh on the EUP; None -> auto (only on v6e/v7x, bf16 path).
    """
    w1, b1, w2, b2, w3, b3, w4, b4 = params
    B, in_dim = x.shape
    hdim = w1.shape[0]  # 256

    if bf16_act is None:
        bf16_act = use_bf16 and _supports_bf16_act()
    mm_dtype = jnp.bfloat16 if use_bf16 else jnp.float32
    act_dtype = jnp.bfloat16 if (use_bf16 and bf16_act) else jnp.float32

    # --- batch tile selection -------------------------------------------------
    blk = max(128, (int(block_b) // 128) * 128)     # multiple of 128
    B128 = _round_up(max(B, 1), 128)
    blk = min(blk, B128)                            # don't tile beyond the batch
    if B128 >= 256:                                 # guarantee >= 2 grid steps so
        blk = min(blk, (B128 // 2 // 128) * 128)    # both v7x TCs get work
    B_pad = _round_up(max(B, 1), blk)

    # Pad only when the batch is ragged; padded rows are computed-then-discarded.
    x_in = x if B_pad == B else jnp.pad(x, ((0, B_pad - B), (0, 0)))

    w1f = w1.astype(jnp.float32)                    # layer 1 stays f32 (tiny K)
    w2m = w2.astype(mm_dtype)
    w3m = w3.astype(mm_dtype)

    # Pack biases + last-layer weight (+ b4 at row 0 of the last column) into
    # one (256, 5) f32 aux operand.
    b4col = jnp.zeros((hdim,), jnp.float32).at[0].set(b4[0].astype(jnp.float32))
    aux = jnp.stack([b1.astype(jnp.float32), b2.astype(jnp.float32),
                     b3.astype(jnp.float32), w4[0].astype(jnp.float32),
                     b4col], axis=1)                # (256, 5)

    kernel = functools.partial(_hedge_mlp_kernel, act_dtype=act_dtype)
    full2d = lambda arr: pl.BlockSpec(arr.shape, lambda i: (0, 0))

    out = pl.pallas_call(
        kernel,
        out_shape=jax.ShapeDtypeStruct((1, B_pad), jnp.float32),
        grid=(B_pad // blk,),
        in_specs=[
            pl.BlockSpec((blk, in_dim), lambda i: (i, 0)),  # x tile (natural layout)
            full2d(w1f),                                    # layer 1 weight (f32)
            full2d(w2m),                                    # layer 2 weight
            full2d(w3m),                                    # layer 3 weight
            full2d(aux),                                    # biases + w4 + b4
        ],
        out_specs=pl.BlockSpec((1, blk), lambda i: (0, i)),
        compiler_params=pltpu.CompilerParams(
            dimension_semantics=("parallel",)),
    )(x_in, w1f, w2m, w3m, aux)

    return out[0, :B]  # drop padding; equals .squeeze(-1)


def init_hedge_mlp_params(key, input_dim):
    """Xavier-normal weights, zero biases (as in _init_weights), PyTorch layout."""
    dims = [(input_dim, 256), (256, 256), (256, 256), (256, 1)]
    params = []
    for fan_in, fan_out in dims:
        key, sub = jax.random.split(key)
        std = (2.0 / (fan_in + fan_out)) ** 0.5
        w = std * jax.random.normal(sub, (fan_out, fan_in), dtype=jnp.float32)
        b = jnp.zeros((fan_out,), dtype=jnp.float32)
        params += [w, b]
    return tuple(params)


def hedge_mlp_reference(x, params):
    """Plain-JAX reference (PyTorch semantics) for correctness checking."""
    w1, b1, w2, b2, w3, b3, w4, b4 = params
    h = jax.nn.sigmoid(x @ w1.T + b1)
    h = jax.nn.sigmoid(h @ w2.T + b2)
    h = jax.nn.sigmoid(h @ w3.T + b3)
    out = jax.nn.sigmoid(h @ w4.T + b4)
    return out[:, 0]


if __name__ == "__main__":
    key = jax.random.PRNGKey(0)
    batch, input_dim = 200, 32  # ragged batch -> exercises padding + a 2-step grid

    k_x, k_p = jax.random.split(key)
    x = jax.random.normal(k_x, (batch, input_dim), dtype=jnp.float32)
    params = init_hedge_mlp_params(k_p, input_dim)

    y_ref = hedge_mlp_reference(x, params)

    # Exact f32 path (numerically matches the PyTorch module).
    y_f32 = jax.block_until_ready(
        hedge_mlp_forward(x, params, use_bf16=False, bf16_act=False))
    assert y_f32.shape == (batch,), y_f32.shape
    assert jnp.allclose(y_f32, y_ref, atol=1e-4, rtol=1e-4), (y_f32, y_ref)

    # Default fast path: bf16 MXU for layers 2-3 (+ bf16 tanh on v6e/v7x only).
    y = jax.block_until_ready(hedge_mlp_forward(x, params))
    assert y.shape == (batch,), y.shape
    assert jnp.allclose(y, y_ref, atol=2e-2, rtol=2e-2), (y, y_ref)

    print("KERNEL_OK")
</pallas_src>

<mosaic_0001>
module attributes {stable_mosaic.version = 11 : i64} {
  func.func @_hedge_mlp_kernel(%arg0: i32, %arg1: memref<128x32xf32, #tpu.memory_space<vmem>>, %arg2: memref<256x32xf32, #tpu.memory_space<vmem>>, %arg3: memref<256x256xf32, #tpu.memory_space<vmem>>, %arg4: memref<256x256xf32, #tpu.memory_space<vmem>>, %arg5: memref<256x5xf32, #tpu.memory_space<vmem>>, %arg6: memref<1x128xf32, #tpu.memory_space<vmem>>) attributes {dimension_semantics = [#tpu.dimension_semantics<parallel>], iteration_bounds = array<i64: 2>, scalar_prefetch = 0 : i64, scratch_operands = 0 : i64, tpu.core_type = #tpu.core_type<tc>, window_params = [{transform_indices = @transform_0, window_bounds = array<i64: 128, 32>}, {pipeline_mode = #tpu.pipeline_mode<synchronous>, transform_indices = @transform_1, window_bounds = array<i64: 256, 32>}, {pipeline_mode = #tpu.pipeline_mode<synchronous>, transform_indices = @transform_2, window_bounds = array<i64: 256, 256>}, {pipeline_mode = #tpu.pipeline_mode<synchronous>, transform_indices = @transform_3, window_bounds = array<i64: 256, 256>}, {pipeline_mode = #tpu.pipeline_mode<synchronous>, transform_indices = @transform_4, window_bounds = array<i64: 256, 5>}, {transform_indices = @transform_5, window_bounds = array<i64: 1, 128>}]} {
    %c0 = arith.constant 0 : index
    %c0_0 = arith.constant 0 : index
    %0 = vector.load %arg5[%c0, %c0_0] : memref<256x5xf32, #tpu.memory_space<vmem>>, vector<256x1xf32>
    %c0_1 = arith.constant 0 : index
    %c1 = arith.constant 1 : index
    %1 = vector.load %arg5[%c0_1, %c1] : memref<256x5xf32, #tpu.memory_space<vmem>>, vector<256x1xf32>
    %c0_2 = arith.constant 0 : index
    %c2 = arith.constant 2 : index
    %2 = vector.load %arg5[%c0_2, %c2] : memref<256x5xf32, #tpu.memory_space<vmem>>, vector<256x1xf32>
    %c0_3 = arith.constant 0 : index
    %c3 = arith.constant 3 : index
    %3 = vector.load %arg5[%c0_3, %c3] : memref<256x5xf32, #tpu.memory_space<vmem>>, vector<256x1xf32>
    %c0_4 = arith.constant 0 : index
    %c4 = arith.constant 4 : index
    %4 = vector.load %arg5[%c0_4, %c4] : memref<256x5xf32, #tpu.memory_space<vmem>>, vector<1x1xf32>
    %c0_5 = arith.constant 0 : index
    %c0_6 = arith.constant 0 : index
    %5 = vector.load %arg1[%c0_5, %c0_6] : memref<128x32xf32, #tpu.memory_space<vmem>>, vector<128x32xf32>
    %c0_7 = arith.constant 0 : index
    %c0_8 = arith.constant 0 : index
    %6 = vector.load %arg2[%c0_7, %c0_8] : memref<256x32xf32, #tpu.memory_space<vmem>>, vector<256x32xf32>
    %cst = arith.constant dense<0.000000e+00> : vector<256x128xf32>
    %7 = tpu.matmul %6, %5, %cst {dimension_numbers = #tpu.dot_dimension_numbers<[1], [1], [0], [0], [0, 0, 1, 0], [], []>} : vector<256x32xf32>, vector<128x32xf32>, vector<256x128xf32> -> vector<256x128xf32>
    %8 = vector.broadcast %0 : vector<256x1xf32> to vector<256x128xf32>
    %9 = arith.addf %7, %8 : vector<256x128xf32>
    %cst_9 = arith.constant 5.000000e-01 : f32
    %10 = vector.broadcast %cst_9 : f32 to vector<256x128xf32>
    %11 = arith.mulf %10, %9 : vector<256x128xf32>
    %12 = math.tanh %11 : vector<256x128xf32>
    %cst_10 = arith.constant 1.000000e+00 : f32
    %13 = vector.broadcast %cst_10 : f32 to vector<256x128xf32>
    %14 = arith.addf %12, %13 : vector<256x128xf32>
    %cst_11 = arith.constant 5.000000e-01 : f32
    %15 = vector.broadcast %cst_11 : f32 to vector<256x128xf32>
    %16 = arith.mulf %15, %14 : vector<256x128xf32>
    %c0_12 = arith.constant 0 : index
    %c0_13 = arith.constant 0 : index
    %17 = vector.load %arg3[%c0_12, %c0_13] : memref<256x256xf32, #tpu.memory_space<vmem>>, vector<256x256xf32>
    %cst_14 = arith.constant dense<0.000000e+00> : vector<256x128xf32>
    %18 = tpu.matmul %17, %16, %cst_14 {dimension_numbers = #tpu.dot_dimension_numbers<[1], [0], [0], [1], [0, 0, 1, 1], [], []>} : vector<256x256xf32>, vector<256x128xf32>, vector<256x128xf32> -> vector<256x128xf32>
    %19 = vector.broadcast %1 : vector<256x1xf32> to vector<256x128xf32>
    %20 = arith.addf %18, %19 : vector<256x128xf32>
    %cst_15 = arith.constant 5.000000e-01 : f32
    %21 = vector.broadcast %cst_15 : f32 to vector<256x128xf32>
    %22 = arith.mulf %21, %20 : vector<256x128xf32>
    %23 = math.tanh %22 : vector<256x128xf32>
    %cst_16 = arith.constant 1.000000e+00 : f32
    %24 = vector.broadcast %cst_16 : f32 to vector<256x128xf32>
    %25 = arith.addf %23, %24 : vector<256x128xf32>
    %cst_17 = arith.constant 5.000000e-01 : f32
    %26 = vector.broadcast %cst_17 : f32 to vector<256x128xf32>
    %27 = arith.mulf %26, %25 : vector<256x128xf32>
    %c0_18 = arith.constant 0 : index
    %c0_19 = arith.constant 0 : index
    %28 = vector.load %arg4[%c0_18, %c0_19] : memref<256x256xf32, #tpu.memory_space<vmem>>, vector<256x256xf32>
    %cst_20 = arith.constant dense<0.000000e+00> : vector<256x128xf32>
    %29 = tpu.matmul %28, %27, %cst_20 {dimension_numbers = #tpu.dot_dimension_numbers<[1], [0], [0], [1], [0, 0, 1, 1], [], []>} : vector<256x256xf32>, vector<256x128xf32>, vector<256x128xf32> -> vector<256x128xf32>
    %30 = vector.broadcast %2 : vector<256x1xf32> to vector<256x128xf32>
    %31 = arith.addf %29, %30 : vector<256x128xf32>
    %cst_21 = arith.constant 5.000000e-01 : f32
    %32 = vector.broadcast %cst_21 : f32 to vector<256x128xf32>
    %33 = arith.mulf %32, %31 : vector<256x128xf32>
    %34 = math.tanh %33 : vector<256x128xf32>
    %cst_22 = arith.constant 1.000000e+00 : f32
    %35 = vector.broadcast %cst_22 : f32 to vector<256x128xf32>
    %36 = arith.addf %34, %35 : vector<256x128xf32>
    %cst_23 = arith.constant 5.000000e-01 : f32
    %37 = vector.broadcast %cst_23 : f32 to vector<256x128xf32>
    %38 = arith.mulf %37, %36 : vector<256x128xf32>
    %39 = vector.broadcast %3 : vector<256x1xf32> to vector<256x128xf32>
    %40 = arith.mulf %39, %38 : vector<256x128xf32>
    %cst_24 = arith.constant dense<0.000000e+00> : vector<128xf32>
    %41 = vector.multi_reduction <add>, %40, %cst_24 [0] : vector<256x128xf32> to vector<128xf32>
    %42 = vector.shape_cast %41 : vector<128xf32> to vector<1x128xf32>
    %43 = vector.broadcast %4 : vector<1x1xf32> to vector<1x128xf32>
    %44 = arith.addf %42, %43 : vector<1x128xf32>
    %cst_25 = arith.constant 5.000000e-01 : f32
    %45 = vector.broadcast %cst_25 : f32 to vector<1x128xf32>
    %46 = arith.mulf %45, %44 : vector<1x128xf32>
    %47 = math.tanh %46 : vector<1x128xf32>
    %cst_26 = arith.constant 1.000000e+00 : f32
    %48 = vector.broadcast %cst_26 : f32 to vector<1x128xf32>
    %49 = arith.addf %47, %48 : vector<1x128xf32>
    %cst_27 = arith.constant 5.000000e-01 : f32
    %50 = vector.broadcast %cst_27 : f32 to vector<1x128xf32>
    %51 = arith.mulf %50, %49 : vector<1x128xf32>
    %c0_28 = arith.constant 0 : index
    %c0_29 = arith.constant 0 : index
    %52 = vector.load %arg6[%c0_28, %c0_29] : memref<1x128xf32, #tpu.memory_space<vmem>>, vector<1x128xf32>
    tpu.vector_store %arg6[%c0_28, %c0_29], %51 {strides = array<i32>} : memref<1x128xf32, #tpu.memory_space<vmem>>, vector<1x128xf32>,
    return
  }
  func.func @transform_0(%arg0: i32) -> (i32, i32) {
    %c0_i32 = arith.constant 0 : i32
    %c0_i32_0 = arith.constant 0 : i32
    return %arg0, %c0_i32 : i32, i32
  }
  func.func @transform_1(%arg0: i32) -> (i32, i32) {
    %c0_i32 = arith.constant 0 : i32
    %c0_i32_0 = arith.constant 0 : i32
    %c0_i32_1 = arith.constant 0 : i32
    return %c0_i32, %c0_i32_0 : i32, i32
  }
  func.func @transform_2(%arg0: i32) -> (i32, i32) {
    %c0_i32 = arith.constant 0 : i32
    %c0_i32_0 = arith.constant 0 : i32
    %c0_i32_1 = arith.constant 0 : i32
    return %c0_i32, %c0_i32_0 : i32, i32
  }
  func.func @transform_3(%arg0: i32) -> (i32, i32) {
    %c0_i32 = arith.constant 0 : i32
    %c0_i32_0 = arith.constant 0 : i32
    %c0_i32_1 = arith.constant 0 : i32
    return %c0_i32, %c0_i32_0 : i32, i32
  }
  func.func @transform_4(%arg0: i32) -> (i32, i32) {
    %c0_i32 = arith.constant 0 : i32
    %c0_i32_0 = arith.constant 0 : i32
    %c0_i32_1 = arith.constant 0 : i32
    return %c0_i32, %c0_i32_0 : i32, i32
  }
  func.func @transform_5(%arg0: i32) -> (i32, i32) {
    %c0_i32 = arith.constant 0 : i32
    %c0_i32_0 = arith.constant 0 : i32
    return %c0_i32, %arg0 : i32, i32
  }
}

</mosaic_0001>

<bundles_post_ra>
// kernel: hedge_mlp_forward.1
= control target key start
LH: loop header
LB: loop body
LE: loop exit
PB: predicated region body
PF: predicated region fallthrough
CT: control target
= control target key end

     0   :  { %10 = vsyncpa [#allocation3], 0  ;;  %s4395_s0 = inlined_call_operand.vmem [shape: f32[256,32], index: 0, kind: input, shape index: {}]   ;;  %s4396_s1 = inlined_call_operand.vmem [shape: f32[256,32], index: 1, kind: input, shape index: {}]   ;;  %s4397_s2 = inlined_call_operand.vmem [shape: f32[256,256], index: 2, kind: input, shape index: {}]   ;;  %s4398_s3 = inlined_call_operand.vmem [shape: f32[256,256], index: 3, kind: input, shape index: {}]   ;;  %s4399_s4 = inlined_call_operand.vmem [shape: f32[256,5], index: 4, kind: input, shape index: {}]   ;;  %s4400_s5 = inlined_call_operand.hbm [shape: f32[1,256], index: 5, kind: output, shape index: {}]  }
   0x1   :  { %12 = vsyncpa [#allocation3 + $0x1], 0  ;;  %s3078_s18 = smov 0   ;;  %s3080_s19 = smov 0  }
   0x2   :  { %s3082_s20 = smov 0   ;;  %s3084_s21 = smov 0  }
   0x3 LB: > { %s2328_s22 = sadd.s32 4294967295, %s3039_s21   ;;  %s2329_s23 = sadd.s32 4294967294, %s3039_s21   ;;  %s3039_s21 = sphi %s3084_s21, %s4408_s21   ;;  %s3035_s20 = sphi %s3082_s20, %s4407_s20   ;;  %s3031_s19 = sphi %s3080_s19, %s4406_s19   ;;  %s3027_s18 = sphi %s3078_s18, %s4405_s18  }
   0x4   : > { %s3101_s24 = sadd.s32 1, %s3039_s21   ;;  %s135_s25 = sadd.s32 1, %s3035_s20 }
   0x5   : > { %s132_s26 = ssub.s32 %s3039_s21, %s3101_s24  ;;  %p145_p0 = scmp.ne.s32.totalorder %s3035_s20, %s3031_s19 }
   0x6   : > { %p133_p1 = scmp.eq.s32.totalorder %s132_s26, 0  ;;  %p146_p2 = scmp.eq.s32.totalorder %s2328_s22, 1 }
   0x7   : > { %p151_p3 = scmp.ne.s32.totalorder %s3031_s19, %s3027_s18  ;;  %p152_p4 = scmp.eq.s32.totalorder %s2329_s23, 1 }
   0x8   : > { %s3111_s27 = scalar_select %p133_p1, %s3035_s20, %s135_s25  }
   0x9   : > { %p3113_p5 = por %p146_p2, %p145_p0  ;;  %p3117_p6 = por %p152_p4, %p151_p3 }
   0xa   : > { %p2332_p7 = scmp.ge.s32.totalorder %s3039_s21, 1  ;;  %p191_p8 = scmp.lt.s32.totalorder %s3039_s21, 3 }
   0xc   : > { %p192_p9 = pnand %p2332_p7, %p191_p8 }
   0xd   : > { %s3123_s30 = sshll.u32 (!%p192_p9), %s2328_s22, 4  ;;  %vm465_vm0 = vcmask (!%p192_p9), 261120   ;;  %v273_v0 = vld [vmem:[%s4396_s1] sm:$0xff] (!%p192_p9)  ;;  %v3041_v1 = vmov (!%p192_p9), 0   ;;  %v3140_v3 = vld [vmem:[%s4399_s4 + $0x10] sm:$0xff] (!%p192_p9)  ;;  %v3157_v5 = vld [vmem:[%s4399_s4 + $0x8] sm:$0xff] (!%p192_p9) }
   0xe   : > { %195 = sbr.rel (%p192_p9) target bundleno = 1137 (0x471), region = 40  ;;  %p219_p10 = scmp.lt.s32.totalorder (!%p192_p9), %s3123_s30, 31  ;;  %2466 = vmatprep.mubr.msk.f32.mxu0 (!%p192_p9), %vm465_vm0, %v273_v0  ;;  %2735 = vset.pattern.permute.xlu0 (!%p192_p9), %v3041_v1  ;;  %v3134_v2 = vld [vmem:[%s4399_s4] sm:$0xff] (!%p192_p9)  ;;  %vm3149_vm1 = vmpackc.low (!%p192_p9), %vm465_vm0, %vm465_vm0  ;;  %v3162_v6 = vld [vmem:[%s4399_s4 + $0x18] sm:$0xff] (!%p192_p9) }
   0xf   : > { %2736 = vset.pattern.permute.xlu1 (!%p192_p9), %v3041_v1  ;;  %307 = vperm.xlu0 (!%p192_p9), %2735, %v3134_v2   ;;  %v3179_v13 = vld [vmem:[%s4399_s4 + $0x20] sm:$0xff] (!%p192_p9)  ;;  %v3187_v16 = vld [vmem:[%s4399_s4 + $0x28] sm:$0xff] (!%p192_p9)  ;;  %v3193_v17 = vld [vmem:[%s4399_s4 + $0x30] sm:$0xff] (!%p192_p9)  ;;  %s216_s15 = sand.u32 (!%p192_p9), 1, %s3031_s19   ;;  %s4353_s26 = scalar_lea.hbm (!%p192_p9), %s4400_s5, %s3123_s30 }
  0x10   : > { %317 = vperm.xlu1 (!%p192_p9), %2736, %v3140_v3   ;;  %v3198_v18 = vld [vmem:[%s4399_s4 + $0x38] sm:$0xff] (!%p192_p9)  ;;  %v3205_v20 = vld [vmem:[%s4399_s4 + $0x40] sm:$0xff] (!%p192_p9)  ;;  %v3212_v21 = vld [vmem:[%s4399_s4 + $0x48] sm:$0xff] (!%p192_p9)  ;;  %s217_s17 = scalar_lea.vmem (!%p192_p9), [#allocation2], %s216_s15  ;;  %s2262_s6 = scalar_lea.sflag (!%p192_p9), [#allocation3], %s216_s15 }
  0x11   : > { %v3223_v24 = vld [vmem:[%s4399_s4 + $0x50] sm:$0xff] (!%p192_p9)  ;;  %v3228_v25 = vld [vmem:[%s4399_s4 + $0x58] sm:$0xff] (!%p192_p9)  ;;  %v3235_v27 = vld [vmem:[%s4399_s4 + $0x60] sm:$0xff] (!%p192_p9)  ;;  %s2274_s22 = sshll.u32 (!%p192_p9), %s217_s17, 4  ;;  %s4355_s22 = int_to_ptr.vmem [resolvable:$true] %s2274_s22 }
  0x12   : > { %v3242_v28 = vld [vmem:[%s4399_s4 + $0x68] sm:$0xff] (!%p192_p9)  ;;  %v3253_v31 = vld [vmem:[%s4399_s4 + $0x70] sm:$0xff] (!%p192_p9)  ;;  %v3258_v32 = vld [vmem:[%s4399_s4 + $0x78] sm:$0xff] (!%p192_p9)  ;;  %s2977_s7 = scalar_lea.vmem (!%p192_p9), %s4355_s22, 16 }
  0x13   : > { %312 = vperm.xlu0 (!%p192_p9), %2735, %v3157_v5   ;;  %v3265_v34 = vld [vmem:[%s4399_s4 + $0x80] sm:$0xff] (!%p192_p9)  ;;  %v3272_v35 = vld [vmem:[%s4399_s4 + $0x88] sm:$0xff] (!%p192_p9)  ;;  %v3283_v38 = vld [vmem:[%s4399_s4 + $0x90] sm:$0xff] (!%p192_p9)  ;;  %p2978_p11 = scmp.ne.s32.totalorder (!%p192_p9), %s4355_s22, %s2977_s7 }
  0x14   : > { %322 = vperm.xlu1 (!%p192_p9), %2736, %v3162_v6   ;;  %v3288_v39 = vld [vmem:[%s4399_s4 + $0x98] sm:$0xff] (!%p192_p9)  ;;  %v3295_v41 = vld [vmem:[%s4399_s4 + $0xa0] sm:$0xff] (!%p192_p9)  ;;  %v3302_v42 = vld [vmem:[%s4399_s4 + $0xa8] sm:$0xff] (!%p192_p9) }
  0x15   : > { %s220_s8 = scalar_select %p219_p10, %s3123_s30, 31  ;;  %v3313_v45 = vld [vmem:[%s4399_s4 + $0xb0] sm:$0xff]  ;;  %v3318_v46 = vld [vmem:[%s4399_s4 + $0xb8] sm:$0xff]  ;;  %v3325_v48 = vld [vmem:[%s4399_s4 + $0xc0] sm:$0xff] }
  0x16   : > { %v3332_v49 = vld [vmem:[%s4399_s4 + $0xc8] sm:$0xff]  ;;  %v3343_v52 = vld [vmem:[%s4399_s4 + $0xd0] sm:$0xff]  ;;  %v3348_v53 = vld [vmem:[%s4399_s4 + $0xd8] sm:$0xff]  ;;  %p2979_p12 = pnand %p2978_p11, %p3113_p5 }
  0x17   : > { %s2334_s11 = sshll.u32 %s220_s8, 3  ;;  %327 = vperm.xlu0 %2735, %v3179_v13   ;;  %v3355_v55 = vld [vmem:[%s4399_s4 + $0xe0] sm:$0xff]  ;;  %v3362_v56 = vld [vmem:[%s4399_s4 + $0xe8] sm:$0xff]  ;;  %v3371_v57 = vld [vmem:[%s4399_s4 + $0xf0] sm:$0xff] }
  0x18   : > { %s3145_s16 = scalar_lea.vmem %s4395_s0, %s2334_s11  ;;  %332 = vperm.xlu1 %2736, %v3187_v16   ;;  %v3376_v58 = vld [vmem:[%s4399_s4 + $0xf8] sm:$0xff]  ;;  %v274_v59 = vld [vmem:[%s4396_s1 + $0x8] sm:$0xff]  ;;  %v275_v60 = vld [vmem:[%s4396_s1 + $0x10] sm:$0xff]  ;;  %p2980_p13 = pneg %p2979_p12 }
  0x19   : > { %v257_v7 = vld [vmem:[%s3145_s16] sm:$0xff]  ;;  %v258_v8 = vld [vmem:[%s3145_s16 + $0x8] sm:$0xff]  ;;  %v259_v9 = vld [vmem:[%s3145_s16 + $0x10] sm:$0xff] }
  0x1a   : > { %v2514_v10 = vpack.c.bf16 %v258_v8, %v257_v7  ;;  %v260_v11 = vld [vmem:[%s3145_s16 + $0x18] sm:$0xff]  ;;  %v261_v14 = vld [vmem:[%s3145_s16 + $0x20] sm:$0xff]  ;;  %v262_v15 = vld [vmem:[%s3145_s16 + $0x28] sm:$0xff] }
  0x1b   : > { %v2520_v12 = vpack.c.bf16 %v260_v11, %v259_v9  ;;  %v2526_v19 = vpack.c.bf16 %v262_v15, %v261_v14  ;;  %337 = vperm.xlu0 %2735, %v3193_v17   ;;  %v263_v22 = vld [vmem:[%s3145_s16 + $0x30] sm:$0xff]  ;;  %v264_v23 = vld [vmem:[%s3145_s16 + $0x38] sm:$0xff]  ;;  %v265_v29 = vld [vmem:[%s3145_s16 + $0x40] sm:$0xff] }
  0x1c   : > { %2516 = vmatprep.subr.msk.bf16.mxu0 %vm3149_vm1, %v2514_v10  ;;  %342 = vperm.xlu1 %2736, %v3198_v18   ;;  %v2532_v26 = vpack.c.bf16 %v264_v23, %v263_v22  ;;  %v266_v30 = vld [vmem:[%s3145_s16 + $0x48] sm:$0xff]  ;;  %v267_v36 = vld [vmem:[%s3145_s16 + $0x50] sm:$0xff]  ;;  %v268_v37 = vld [vmem:[%s3145_s16 + $0x58] sm:$0xff] }
  0x1d   : > { %2519 = vmatpush3.bf16.xpose.msk.msra.mxu0 %vm3149_vm1, %v2514_v10  ;;  %v2538_v33 = vpack.c.bf16 %v266_v30, %v265_v29  ;;  %v2544_v40 = vpack.c.bf16 %v268_v37, %v267_v36  ;;  %v269_v43 = vld [vmem:[%s3145_s16 + $0x60] sm:$0xff]  ;;  %v270_v44 = vld [vmem:[%s3145_s16 + $0x68] sm:$0xff]  ;;  %v271_v50 = vld [vmem:[%s3145_s16 + $0x70] sm:$0xff] }
  0x1e   : > { %2522 = vmatprep.subr.msk.bf16.mxu0 %vm3149_vm1, %v2520_v12  ;;  %v2550_v47 = vpack.c.bf16 %v270_v44, %v269_v43  ;;  %v272_v51 = vld [vmem:[%s3145_s16 + $0x78] sm:$0xff]  ;;  %v277_v62 = vld [vmem:[%s4396_s1 + $0x20] sm:$0xff]  ;;  %v278_v63 = vld [vmem:[%s4396_s1 + $0x28] sm:$0xff]  ;;  %s3047_s16 = smov [#allocation2]  }
  0x1f   : > { %347 = vperm.xlu0 %2735, %v3205_v20   ;;  %v2556_v54 = vpack.c.bf16 %v272_v51, %v271_v50  ;;  %v276_v61 = vld [vmem:[%s4396_s1 + $0x18] sm:$0xff]  ;;  %v279_v0 = vld [vmem:[%s4396_s1 + $0x30] sm:$0xff]  ;;  %v281_v4 = vld [vmem:[%s4396_s1 + $0x40] sm:$0xff]  ;;  %s2981_s8 = sshll.u32 %s3047_s16, 4  ;;  %s2982_s8 = int_to_ptr.vmem [resolvable:$false] %s2981_s8 }
  0x20   : > { %352 = vperm.xlu1 %2736, %v3212_v21   ;;  %v280_v1 = vld [vmem:[%s4396_s1 + $0x38] sm:$0xff]  ;;  %v282_v7 = vld [vmem:[%s4396_s1 + $0x48] sm:$0xff]  ;;  %v283_v8 = vld [vmem:[%s4396_s1 + $0x50] sm:$0xff]  ;;  %s2983_s9 = scalar_lea.vmem %s2982_s8, 32  ;;  %p2984_p0 = scmp.lt.s32.totalorder %s4355_s22, %s2982_s8 }
  0x21   : > { %v284_v9 = vld [vmem:[%s4396_s1 + $0x58] sm:$0xff]  ;;  %v285_v10 = vld [vmem:[%s4396_s1 + $0x60] sm:$0xff]  ;;  %v286_v11 = vld [vmem:[%s4396_s1 + $0x68] sm:$0xff]  ;;  %p2985_p1 = scmp.lt.s32.totalorder %s2983_s9, %s2977_s7 }
  0x22   : > { %v288_v14 = vld [vmem:[%s4396_s1 + $0x78] sm:$0xff]  ;;  %v289_v15 = vld [vmem:[%s4396_s1 + $0x80] sm:$0xff]  ;;  %v291_v22 = vld [vmem:[%s4396_s1 + $0x90] sm:$0xff] }
  0x23   : > { %357 = vperm.xlu0 %2735, %v3223_v24   ;;  %v292_v23 = vld [vmem:[%s4396_s1 + $0x98] sm:$0xff]  ;;  %v294_v29 = vld [vmem:[%s4396_s1 + $0xa8] sm:$0xff]  ;;  %v295_v30 = vld [vmem:[%s4396_s1 + $0xb0] sm:$0xff]  ;;  %p2986_p2 = por %p2985_p1, %p2984_p0 }
  0x24   : > { %362 = vperm.xlu1 %2736, %v3228_v25   ;;  %v297_v36 = vld [vmem:[%s4396_s1 + $0xc0] sm:$0xff]  ;;  %v298_v37 = vld [vmem:[%s4396_s1 + $0xc8] sm:$0xff]  ;;  %v300_v43 = vld [vmem:[%s4396_s1 + $0xd8] sm:$0xff] }
  0x25   : > { %2525 = vmatpush3.bf16.xpose.msk.msra.mxu0 %vm3149_vm1, %v2520_v12  ;;  %v287_v12 = vld [vmem:[%s4396_s1 + $0x70] sm:$0xff]  ;;  %v301_v44 = vld [vmem:[%s4396_s1 + $0xe0] sm:$0xff]  ;;  %v304_v51 = vld [vmem:[%s4396_s1 + $0xf8] sm:$0xff]  ;;  %p2987_p3 = pnand %p2986_p2, %p2980_p13 }
  0x26   : > { %2528 = vmatprep.subr.msk.bf16.mxu0 %vm3149_vm1, %v2526_v19  ;;  %v303_v50 = vld [vmem:[%s4396_s1 + $0xf0] sm:$0xff] }
  0x27   : > { %367 = vperm.xlu0 %2735, %v3235_v27  }
  0x28   : > { %372 = vperm.xlu1 %2736, %v3242_v28  }
  0x2b   : > { %377 = vperm.xlu0 %2735, %v3253_v31  }
  0x2c   : > { %382 = vperm.xlu1 %2736, %v3258_v32  }
  0x2d   : > { %2531 = vmatpush3.bf16.xpose.msk.msra.mxu0 %vm3149_vm1, %v2526_v19  ;;  %v290_v19 = vld [vmem:[%s4396_s1 + $0x88] sm:$0xff] }
  0x2e   : > { %2534 = vmatprep.subr.msk.bf16.mxu0 %vm3149_vm1, %v2532_v26 }
  0x2f   : > { %387 = vperm.xlu0 %2735, %v3265_v34  }
  0x30   : > { %392 = vperm.xlu1 %2736, %v3272_v35  }
  0x33   : > { %397 = vperm.xlu0 %2735, %v3283_v38  }
  0x34   : > { %402 = vperm.xlu1 %2736, %v3288_v39  }
  0x35   : > { %2537 = vmatpush3.bf16.xpose.msk.msra.mxu0 %vm3149_vm1, %v2532_v26  ;;  %v293_v26 = vld [vmem:[%s4396_s1 + $0xa0] sm:$0xff] }
  0x36   : > { %2540 = vmatprep.subr.msk.bf16.mxu0 %vm3149_vm1, %v2538_v33 }
  0x37   : > { %407 = vperm.xlu0 %2735, %v3295_v41  }
  0x38   : > { %412 = vperm.xlu1 %2736, %v3302_v42  }
  0x3b   : > { %417 = vperm.xlu0 %2735, %v3313_v45  }
  0x3c   : > { %422 = vperm.xlu1 %2736, %v3318_v46  }
  0x3d   : > { %2543 = vmatpush3.bf16.xpose.msk.msra.mxu0 %vm3149_vm1, %v2538_v33  ;;  %v296_v33 = vld [vmem:[%s4396_s1 + $0xb8] sm:$0xff] }
  0x3e   : > { %2546 = vmatprep.subr.msk.bf16.mxu0 %vm3149_vm1, %v2544_v40 }
  0x3f   : > { %427 = vperm.xlu0 %2735, %v3325_v48  }
  0x40   : > { %432 = vperm.xlu1 %2736, %v3332_v49  }
  0x43   : > { %437 = vperm.xlu0 %2735, %v3343_v52  }
  0x44   : > { %442 = vperm.xlu1 %2736, %v3348_v53  }
  0x45   : > { %2549 = vmatpush3.bf16.xpose.msk.msra.mxu0 %vm3149_vm1, %v2544_v40  ;;  %v299_v40 = vld [vmem:[%s4396_s1 + $0xd0] sm:$0xff] }
  0x46   : > { %2552 = vmatprep.subr.msk.bf16.mxu0 %vm3149_vm1, %v2550_v47 }
  0x47   : > { %447 = vperm.xlu0 %2735, %v3355_v55  }
  0x48   : > { %452 = vperm.xlu1 %2736, %v3362_v56  }
  0x4b   : > { %457 = vperm.xlu0 %2735, %v3371_v57  }
  0x4c   : > { %462 = vperm.xlu1 %2736, %v3376_v58  }
  0x4d   : > { %2555 = vmatpush3.bf16.xpose.msk.msra.mxu0 %vm3149_vm1, %v2550_v47  ;;  %v302_v47 = vld [vmem:[%s4396_s1 + $0xe8] sm:$0xff] }
  0x4e   : > { %2558 = vmatprep.subr.msk.bf16.mxu0 %vm3149_vm1, %v2556_v54 }
  0x55   : > { %2561 = vmatpush3.bf16.xpose.msk.msra.mxu0 %vm3149_vm1, %v2556_v54  ;;  %v3042_v54 = vmov 0.0|0.0  }
  0x56   : > { %2562 = vmatprep.subr.bf16.mxu1 %v3042_v54  ;;  %2610 = vmatprep.subr.bf16.mxu0 %v3042_v54 }
  0x5c   : > { %2467 = vmatmul.mubr.msk.f32.vlgmr.msra.gmra.mrb[0].mxu0 %vm465_vm0, %v274_v59  ;;  %v964_v59 = vld [vmem:[%s4397_s2 + $0x8] sm:$0xff] }
  0x5d   : > { %2469 = vmatprep.mubr.msk.f32.mxu0 %vm465_vm0, %v275_v60  ;;  %1219 = vmatprep.mubr.f32.mxu1 %v964_v59 }
  0x60   : > { %2470 = vmatmul.mubr.msk.f32.gmra.mrb[2].mxu0 %vm465_vm0, %v276_v61 }
  0x61   : > { %2472 = vmatprep.mubr.msk.f32.mxu0 %vm465_vm0, %v277_v62 }
  0x64   : > { %2473 = vmatmul.mubr.msk.f32.gmra.mrb[4].mxu0 %vm465_vm0, %v278_v63 }
  0x65   : > { %2475 = vmatprep.mubr.msk.f32.mxu0 %vm465_vm0, %v279_v0 }
  0x68   : > { %2476 = vmatmul.mubr.msk.f32.gmra.mrb[6].mxu0 %vm465_vm0, %v280_v1 }
  0x69   : > { %2478 = vmatprep.mubr.msk.f32.mxu0 %vm465_vm0, %v281_v4 }
  0x6c   : > { %2479 = vmatmul.mubr.msk.f32.gmra.mrb[8].mxu0 %vm465_vm0, %v282_v7 }
  0x6d   : > { %2481 = vmatprep.mubr.msk.f32.mxu0 %vm465_vm0, %v283_v8 }
  0x70   : > { %2482 = vmatmul.mubr.msk.f32.gmra.mrb[10].mxu0 %vm465_vm0, %v284_v9 }
  0x71   : > { %2484 = vmatprep.mubr.msk.f32.mxu0 %vm465_vm0, %v285_v10 }
  0x74   : > { %2485 = vmatmul.mubr.msk.f32.gmra.mrb[12].mxu0 %vm465_vm0, %v286_v11 }
  0x75   : > { %2487 = vmatprep.mubr.msk.f32.mxu0 %vm465_vm0, %v287_v12 }
  0x78   : > { %2488 = vmatmul.mubr.msk.f32.gmra.mrb[14].mxu0 %vm465_vm0, %v288_v14 }
  0x79   : > { %2490 = vmatprep.mubr.msk.f32.mxu0 %vm465_vm0, %v289_v15 }
  0x7c   : > { %2491 = vmatmul.mubr.msk.f32.gmra.mrb[16].mxu0 %vm465_vm0, %v290_v19 }
  0x7d   : > { %2493 = vmatprep.mubr.msk.f32.mxu0 %vm465_vm0, %v291_v22 }
  0x80   : > { %2494 = vmatmul.mubr.msk.f32.gmra.mrb[18].mxu0 %vm465_vm0, %v292_v23 }
  0x81   : > { %2496 = vmatprep.mubr.msk.f32.mxu0 %vm465_vm0, %v293_v26 }
  0x84   : > { %2497 = vmatmul.mubr.msk.f32.gmra.mrb[20].mxu0 %vm465_vm0, %v294_v29 }
  0x85   : > { %2499 = vmatprep.mubr.msk.f32.mxu0 %vm465_vm0, %v295_v30 }
  0x88   : > { %2500 = vmatmul.mubr.msk.f32.gmra.mrb[22].mxu0 %vm465_vm0, %v296_v33 }
  0x89   : > { %2502 = vmatprep.mubr.msk.f32.mxu0 %vm465_vm0, %v297_v36 }
  0x8c   : > { %2503 = vmatmul.mubr.msk.f32.gmra.mrb[24].mxu0 %vm465_vm0, %v298_v37 }
  0x8d   : > { %2505 = vmatprep.mubr.msk.f32.mxu0 %vm465_vm0, %v299_v40 }
  0x8e   : > { %v308_v61 = vpop.permute.xlu0 %307 }
  0x8f   : > { %v318_v60 = vpop.permute.xlu1 %317 }
  0x90   : > { %2506 = vmatmul.mubr.msk.f32.gmra.mrb[26].mxu0 %vm465_vm0, %v300_v43 }
  0x91   : > { %2508 = vmatprep.mubr.msk.f32.mxu0 %vm465_vm0, %v301_v44 }
  0x92   : > { %v313_v63 = vpop.permute.xlu0 %312 }
  0x93   : > { %v323_v62 = vpop.permute.xlu1 %322 }
  0x94   : > { %2509 = vmatmul.mubr.msk.f32.gmra.mrb[28].mxu0 %vm465_vm0, %v302_v47 }
  0x95   : > { %2511 = vmatprep.mubr.msk.f32.mxu0 %vm465_vm0, %v303_v50 }
  0x96   : > { %v328_v1 = vpop.permute.xlu0 %327 }
  0x97   : > { %v333_v0 = vpop.permute.xlu1 %332 }
  0x98   : > { %2512 = vmatmul.mubr.msk.f32.gmra.mrb[30].mxu0 %vm465_vm0, %v304_v51 }
  0x9a   : > { %v338_v7 = vpop.permute.xlu0 %337 }
  0x9b   : > { %v343_v4 = vpop.permute.xlu1 %342 }
  0x9e   : > { %v348_v9 = vpop.permute.xlu0 %347 }
  0x9f   : > { %v353_v8 = vpop.permute.xlu1 %352 }
  0xa2   : > { %v358_v12 = vpop.permute.xlu0 %357 }
  0xa3   : > { %v363_v10 = vpop.permute.xlu1 %362 }
  0xa6   : > { %v3513_v37 = vpop.permute.xlu0 %367 }
  0xa7   : > { %v3511_v33 = vpop.permute.xlu1 %372 }
 0x12f   : > { %v2468_v11 = vpop.f32.mrb[0].mxu0 }
 0x130   : > { %v682_v14 = vadd.f32 %v2468_v11, %v313_v63  ;;  %v676_v15 = vpop.f32.mrb[1].mxu0  ;;  %v3517_v11 = vpop.permute.xlu0 %377 }
 0x131   : > { %v677_v19 = vadd.f32 %v676_v15, %v308_v61  ;;  %v3515_v61 = vpop.permute.xlu1 %382 }
 0x132   : > { %v836_v22 = vmul.f32 0.5, %v682_v14 }
 0x133   : > { %v835_v23 = vmul.f32 0.5, %v677_v19  ;;  %v2471_v26 = vpop.f32.mrb[2].mxu0 }
 0x134   : > { %2751 = vtanh.f32 %v836_v22  ;;  %v692_v29 = vadd.f32 %v2471_v26, %v323_v62  ;;  %v686_v30 = vpop.f32.mrb[3].mxu0 }
 0x135   : > { %2753 = vtanh.f32 %v835_v23  ;;  %v687_v36 = vadd.f32 %v686_v30, %v318_v60 }
 0x136   : > { %v838_v40 = vmul.f32 0.5, %v692_v29 }
 0x137   : > { %v837_v43 = vmul.f32 0.5, %v687_v36  ;;  %v2474_v44 = vpop.f32.mrb[4].mxu0 }
 0x138   : > { %2755 = vtanh.f32 %v838_v40  ;;  %v702_v47 = vadd.f32 %v2474_v44, %v333_v0  ;;  %v696_v50 = vpop.f32.mrb[5].mxu0  ;;  %v3519_v40 = vpop.permute.xlu1 %392 }
 0x139   : > { %2757 = vtanh.f32 %v837_v43  ;;  %v697_v51 = vadd.f32 %v696_v50, %v328_v1 }
 0x13a   : > { %v840_v59 = vmul.f32 0.5, %v702_v47 }
 0x13b   : > { %v839_v63 = vmul.f32 0.5, %v697_v51  ;;  %v2477_v62 = vpop.f32.mrb[6].mxu0 }
 0x13c   : > { %2759 = vtanh.f32 %v840_v59  ;;  %v712_v14 = vadd.f32 %v2477_v62, %v343_v4  ;;  %v706_v60 = vpop.f32.mrb[7].mxu0  ;;  %v3521_v4 = vpop.permute.xlu0 %387 }
 0x13d   : > { %2761 = vtanh.f32 %v839_v63  ;;  %v707_v15 = vadd.f32 %v706_v60, %v338_v7 }
 0x13e   : > { %v2752_v19 = vpop.eup %2751  ;;  %v842_v22 = vmul.f32 0.5, %v712_v14 }
 0x13f   : > { %v2754_v23 = vpop.eup %2753  ;;  %v841_v26 = vmul.f32 0.5, %v707_v15  ;;  %v2480_v0 = vpop.f32.mrb[8].mxu0  ;;  %v900_v29 = vadd.f32 1.0, %v2752_v19 }
 0x140   : > { %2763 = vtanh.f32 %v842_v22  ;;  %v722_v1 = vadd.f32 %v2480_v0, %v353_v8  ;;  %v716_v30 = vpop.f32.mrb[9].mxu0  ;;  %v899_v36 = vadd.f32 1.0, %v2754_v23 }
 0x141   : > { %2765 = vtanh.f32 %v841_v26  ;;  %v717_v43 = vadd.f32 %v716_v30, %v348_v9  ;;  %v932_v44 = vmul.f32 0.5, %v900_v29  ;;  %v3523_v29 = vpop.permute.xlu1 %402 }
 0x142   : > { %v2756_v47 = vpop.eup %2755  ;;  %v844_v50 = vmul.f32 0.5, %v722_v1  ;;  %v931_v7 = vmul.f32 0.5, %v899_v36 }
 0x143   : > { %v2758_v51 = vpop.eup %2757  ;;  %v902_v59 = vadd.f32 1.0, %v2756_v47  ;;  %v843_v63 = vmul.f32 0.5, %v717_v43  ;;  %v2483_v62 = vpop.f32.mrb[10].mxu0 }
 0x144   : > { %v901_v14 = vadd.f32 1.0, %v2758_v51  ;;  %2767 = vtanh.f32 %v844_v50  ;;  %v732_v60 = vadd.f32 %v2483_v62, %v363_v10  ;;  %v726_v8 = vpop.f32.mrb[11].mxu0  ;;  %v2563_v15 = vpack.c.bf16 %v932_v44, %v931_v7  ;;  %v3526_v43 = vpop.permute.xlu0 %397 }
 0x145   : > { %v934_v19 = vmul.f32 0.5, %v902_v59  ;;  %2769 = vtanh.f32 %v843_v63  ;;  %v727_v22 = vadd.f32 %v726_v8, %v358_v12 }
 0x146   : > { %v2760_v23 = vpop.eup %2759  ;;  %v933_v9 = vmul.f32 0.5, %v901_v14  ;;  %v846_v26 = vmul.f32 0.5, %v732_v60  ;;  %2564 = vmatpush1.bf16.msra.mxu1 %v2563_v15 }
 0x147   : > { %v2762_v0 = vpop.eup %2761  ;;  %v904_v1 = vadd.f32 1.0, %v2760_v23  ;;  %v845_v30 = vmul.f32 0.5, %v727_v22  ;;  %v2486_v36 = vpop.f32.mrb[12].mxu0  ;;  %2565 = vmatprep.subr.bf16.mxu1 %v3042_v54 }
 0x148   : > { %v903_v10 = vadd.f32 1.0, %v2762_v0  ;;  %2771 = vtanh.f32 %v846_v26  ;;  %v742_v44 = vadd.f32 %v2486_v36, %v3511_v33  ;;  %v736_v47 = vpop.f32.mrb[13].mxu0  ;;  %v2566_v12 = vpack.c.bf16 %v934_v19, %v933_v9  ;;  %v413_v23 = vpop.permute.xlu1 %412 }
 0x149   : > { %v936_v50 = vmul.f32 0.5, %v904_v1  ;;  %2773 = vtanh.f32 %v845_v30  ;;  %v737_v7 = vadd.f32 %v736_v47, %v3513_v37  ;;  %v408_v0 = vpop.permute.xlu0 %407 }
 0x14a   : > { %v2764_v51 = vpop.eup %2763  ;;  %v935_v59 = vmul.f32 0.5, %v903_v10  ;;  %v848_v63 = vmul.f32 0.5, %v742_v44  ;;  %2567 = vmatpush1.bf16.msra.mxu1 %v2566_v12 }
 0x14b   : > { %v2766_v62 = vpop.eup %2765  ;;  %v906_v14 = vadd.f32 1.0, %v2764_v51  ;;  %v847_v60 = vmul.f32 0.5, %v737_v7  ;;  %v2489_v8 = vpop.f32.mrb[14].mxu0  ;;  %2568 = vmatprep.subr.bf16.mxu1 %v3042_v54 }
 0x14c   : > { %v905_v15 = vadd.f32 1.0, %v2766_v62  ;;  %2775 = vtanh.f32 %v848_v63  ;;  %v752_v33 = vadd.f32 %v2489_v8, %v3515_v61  ;;  %v746_v22 = vpop.f32.mrb[15].mxu0  ;;  %v2569_v19 = vpack.c.bf16 %v936_v50, %v935_v59 }
 0x14d   : > { %v938_v9 = vmul.f32 0.5, %v906_v14  ;;  %2777 = vtanh.f32 %v847_v60  ;;  %v747_v37 = vadd.f32 %v746_v22, %v3517_v11  ;;  %v423_v60 = vpop.permute.xlu1 %422  ;;  %v418_v22 = vpop.permute.xlu0 %417 }
 0x14e   : > { %v2768_v26 = vpop.eup %2767  ;;  %v937_v1 = vmul.f32 0.5, %v905_v15  ;;  %v850_v30 = vmul.f32 0.5, %v752_v33  ;;  %2570 = vmatpush1.bf16.msra.mxu1 %v2569_v19 }
 0x14f   : > { %v2770_v36 = vpop.eup %2769  ;;  %v908_v10 = vadd.f32 1.0, %v2768_v26  ;;  %v849_v44 = vmul.f32 0.5, %v747_v37  ;;  %v2492_v47 = vpop.f32.mrb[16].mxu0  ;;  %2571 = vmatprep.subr.bf16.mxu1 %v3042_v54 }
 0x150   : > { %v907_v12 = vadd.f32 1.0, %v2770_v36  ;;  %2779 = vtanh.f32 %v850_v30  ;;  %v762_v61 = vadd.f32 %v2492_v47, %v3519_v40  ;;  %v756_v50 = vpop.f32.mrb[17].mxu0  ;;  %v2572_v7 = vpack.c.bf16 %v938_v9, %v937_v1 }
 0x151   : > { %v940_v51 = vmul.f32 0.5, %v908_v10  ;;  %2781 = vtanh.f32 %v849_v44  ;;  %v757_v11 = vadd.f32 %v756_v50, %v3521_v4  ;;  %v3043_v10 = vmov 1  }
 0x152   : > { %v2772_v59 = vpop.eup %2771  ;;  %v939_v63 = vmul.f32 0.5, %v907_v12  ;;  %v852_v62 = vmul.f32 0.5, %v762_v61  ;;  %2573 = vmatpush1.bf16.msra.mxu1 %v2572_v7  ;;  %2737 = vset.pattern.permute.xlu0 %v3043_v10 }
 0x153   : > { %v2774_v14 = vpop.eup %2773  ;;  %v910_v8 = vadd.f32 1.0, %v2772_v59  ;;  %v851_v15 = vmul.f32 0.5, %v757_v11  ;;  %v2495_v33 = vpop.f32.mrb[18].mxu0  ;;  %2574 = vmatprep.subr.bf16.mxu1 %v3042_v54  ;;  %1028 = vperm.xlu0 %2737, %v3134_v2  }
 0x154   : > { %v909_v19 = vadd.f32 1.0, %v2774_v14  ;;  %2783 = vtanh.f32 %v852_v62  ;;  %v772_v40 = vadd.f32 %v2495_v33, %v3523_v29  ;;  %v766_v9 = vpop.f32.mrb[19].mxu0  ;;  %v2575_v37 = vpack.c.bf16 %v940_v51, %v939_v63  ;;  %2738 = vset.pattern.permute.xlu1 %v3043_v10  ;;  %v428_v62 = vpop.permute.xlu0 %427 }
 0x155   : > { %v942_v26 = vmul.f32 0.5, %v910_v8  ;;  %2785 = vtanh.f32 %v851_v15  ;;  %v767_v4 = vadd.f32 %v766_v9, %v3526_v43  ;;  %v433_v43 = vpop.permute.xlu1 %432  ;;  %1032 = vperm.xlu1 %2738, %v3157_v5  }
 0x156   : > { %v2776_v1 = vpop.eup %2775  ;;  %v941_v30 = vmul.f32 0.5, %v909_v19  ;;  %v854_v36 = vmul.f32 0.5, %v772_v40  ;;  %2576 = vmatpush1.bf16.msra.mxu1 %v2575_v37 }
 0x157   : > { %v2778_v44 = vpop.eup %2777  ;;  %v912_v47 = vadd.f32 1.0, %v2776_v1  ;;  %v853_v12 = vmul.f32 0.5, %v767_v4  ;;  %v2498_v61 = vpop.f32.mrb[20].mxu0  ;;  %2577 = vmatprep.subr.bf16.mxu1 %v3042_v54  ;;  %1040 = vperm.xlu0 %2737, %v3162_v6  }
 0x158   : > { %v911_v29 = vadd.f32 1.0, %v2778_v44  ;;  %2787 = vtanh.f32 %v854_v36  ;;  %v782_v50 = vadd.f32 %v2498_v61, %v413_v23  ;;  %v776_v7 = vpop.f32.mrb[21].mxu0  ;;  %v2578_v51 = vpack.c.bf16 %v942_v26, %v941_v30  ;;  %v438_v6 = vpop.permute.xlu0 %437 }
 0x159   : > { %v944_v11 = vmul.f32 0.5, %v912_v47  ;;  %2789 = vtanh.f32 %v853_v12  ;;  %v777_v59 = vadd.f32 %v776_v7, %v408_v0  ;;  %1036 = vperm.xlu1 %2738, %v3140_v3   ;;  %v443_v36 = vpop.permute.xlu1 %442 }
 0x15a   : > { %v2780_v63 = vpop.eup %2779  ;;  %v943_v14 = vmul.f32 0.5, %v911_v29  ;;  %v856_v8 = vmul.f32 0.5, %v782_v50  ;;  %2579 = vmatpush1.bf16.msra.mxu1 %v2578_v51 }
 0x15b   : > { %v2782_v15 = vpop.eup %2781  ;;  %v914_v33 = vadd.f32 1.0, %v2780_v63  ;;  %v855_v2 = vmul.f32 0.5, %v777_v59  ;;  %v2501_v19 = vpop.f32.mrb[22].mxu0  ;;  %2580 = vmatprep.subr.bf16.mxu1 %v3042_v54  ;;  %1048 = vperm.xlu0 %2737, %v3187_v16  }
 0x15c   : > { %v913_v23 = vadd.f32 1.0, %v2782_v15  ;;  %2791 = vtanh.f32 %v856_v8  ;;  %v792_v40 = vadd.f32 %v2501_v19, %v423_v60  ;;  %v786_v9 = vpop.f32.mrb[23].mxu0  ;;  %v2581_v0 = vpack.c.bf16 %v944_v11, %v943_v14  ;;  %v448_v19 = vpop.permute.xlu0 %447 }
 0x15d   : > { %v946_v37 = vmul.f32 0.5, %v914_v33  ;;  %2793 = vtanh.f32 %v855_v2  ;;  %v787_v5 = vadd.f32 %v786_v9, %v418_v22  ;;  %1044 = vperm.xlu1 %2738, %v3179_v13  }
 0x15e   : > { %v2784_v26 = vpop.eup %2783  ;;  %v945_v4 = vmul.f32 0.5, %v913_v23  ;;  %v858_v1 = vmul.f32 0.5, %v792_v40  ;;  %2582 = vmatpush1.bf16.msra.mxu1 %v2581_v0 }
 0x15f   : > { %v2786_v30 = vpop.eup %2785  ;;  %v916_v10 = vadd.f32 1.0, %v2784_v26  ;;  %v857_v44 = vmul.f32 0.5, %v787_v5  ;;  %v2504_v47 = vpop.f32.mrb[24].mxu0  ;;  %2583 = vmatprep.subr.bf16.mxu1 %v3042_v54  ;;  %1056 = vperm.xlu0 %2737, %v3198_v18  }
 0x160   : > { %v915_v60 = vadd.f32 1.0, %v2786_v30  ;;  %2795 = vtanh.f32 %v858_v1  ;;  %v802_v12 = vadd.f32 %v2504_v47, %v433_v43  ;;  %v796_v22 = vpop.f32.mrb[25].mxu0  ;;  %v2584_v61 = vpack.c.bf16 %v946_v37, %v945_v4 }
 0x161   : > { %v948_v3 = vmul.f32 0.5, %v916_v10  ;;  %2797 = vtanh.f32 %v857_v44  ;;  %v797_v29 = vadd.f32 %v796_v22, %v428_v62  ;;  %v453_v62 = vpop.permute.xlu1 %452  ;;  %1052 = vperm.xlu1 %2738, %v3193_v17  }
 0x162   : > { %v2788_v50 = vpop.eup %2787  ;;  %v947_v7 = vmul.f32 0.5, %v915_v60  ;;  %v860_v51 = vmul.f32 0.5, %v802_v12  ;;  %2585 = vmatpush1.bf16.msra.mxu1 %v2584_v61 }
 0x163   : > { %v2790_v11 = vpop.eup %2789  ;;  %v918_v59 = vadd.f32 1.0, %v2788_v50  ;;  %v859_v63 = vmul.f32 0.5, %v797_v29  ;;  %v2507_v14 = vpop.f32.mrb[26].mxu0  ;;  %2586 = vmatprep.subr.bf16.mxu1 %v3042_v54  ;;  %1064 = vperm.xlu0 %2737, %v3212_v21  }
 0x164   : > { %v917_v16 = vadd.f32 1.0, %v2790_v11  ;;  %2799 = vtanh.f32 %v860_v51  ;;  %v812_v43 = vadd.f32 %v2507_v14, %v443_v36  ;;  %v806_v8 = vpop.f32.mrb[27].mxu0  ;;  %v2587_v15 = vpack.c.bf16 %v948_v3, %v947_v7  ;;  %v458_v21 = vpop.permute.xlu0 %457 }
 0x165   : > { %v950_v33 = vmul.f32 0.5, %v918_v59  ;;  %2801 = vtanh.f32 %v859_v63  ;;  %v807_v13 = vadd.f32 %v806_v8, %v438_v6  ;;  %1060 = vperm.xlu1 %2738, %v3205_v20   ;;  %v463_v6 = vpop.permute.xlu1 %462 }
 0x166   : > { %v2792_v2 = vpop.eup %2791  ;;  %v949_v23 = vmul.f32 0.5, %v917_v16  ;;  %v862_v40 = vmul.f32 0.5, %v812_v43  ;;  %2588 = vmatpush1.bf16.msra.mxu1 %v2587_v15 }
 0x167   : > { %v2794_v9 = vpop.eup %2793  ;;  %v920_v0 = vadd.f32 1.0, %v2792_v2  ;;  %v861_v37 = vmul.f32 0.5, %v807_v13  ;;  %v2510_v18 = vpop.f32.mrb[28].mxu0  ;;  %2589 = vmatprep.subr.bf16.mxu1 %v3042_v54  ;;  %1072 = vperm.xlu0 %2737, %v3228_v25  }
 0x168   : > { %v919_v5 = vadd.f32 1.0, %v2794_v9  ;;  %2803 = vtanh.f32 %v862_v40  ;;  %v822_v26 = vadd.f32 %v2510_v18, %v453_v62  ;;  %v816_v4 = vpop.f32.mrb[29].mxu0  ;;  %v2590_v1 = vpack.c.bf16 %v950_v33, %v949_v23 }
 0x169   : > { %v952_v30 = vmul.f32 0.5, %v920_v0  ;;  %2805 = vtanh.f32 %v861_v37  ;;  %v817_v17 = vadd.f32 %v816_v4, %v448_v19  ;;  %1068 = vperm.xlu1 %2738, %v3223_v24  }
 0x16a   : > { %v2796_v36 = vpop.eup %2795  ;;  %v951_v10 = vmul.f32 0.5, %v919_v5  ;;  %v864_v44 = vmul.f32 0.5, %v822_v26  ;;  %2591 = vmatpush1.bf16.msra.mxu1 %v2590_v1 }
 0x16b   : > { %v2798_v47 = vpop.eup %2797  ;;  %v922_v60 = vadd.f32 1.0, %v2796_v36  ;;  %v863_v12 = vmul.f32 0.5, %v817_v17  ;;  %v2513_v22 = vpop.f32.mrb[30].mxu0  ;;  %2592 = vmatprep.subr.bf16.mxu1 %v3042_v54  ;;  %1080 = vperm.xlu0 %2737, %v3242_v28   ;;  %v980_v17 = vld [vmem:[%s4397_s2 + $0x88] sm:$0xff]  ;;  %v979_v36 = vld [vmem:[%s4397_s2 + $0x80] sm:$0xff] }
 0x16c   : > { %v921_v61 = vadd.f32 1.0, %v2798_v47  ;;  %2807 = vtanh.f32 %v864_v44  ;;  %v832_v3 = vadd.f32 %v2513_v22, %v463_v6  ;;  %v826_v29 = vpop.f32.mrb[31].mxu0  ;;  %v2593_v50 = vpack.c.bf16 %v952_v30, %v951_v10  ;;  %v963_v30 = vld [vmem:[%s4397_s2] sm:$0xff]  ;;  %v982_v10 = vld [vmem:[%s4397_s2 + $0x98] sm:$0xff]  ;;  %v981_v44 = vld [vmem:[%s4397_s2 + $0x90] sm:$0xff] }
 0x16d   : > { %v954_v20 = vmul.f32 0.5, %v922_v60  ;;  %2809 = vtanh.f32 %v863_v12  ;;  %v827_v7 = vadd.f32 %v826_v29, %v458_v21  ;;  %1076 = vperm.xlu1 %2738, %v3235_v27   ;;  %v984_v47 = vld [vmem:[%s4397_s2 + $0xa8] sm:$0xff]  ;;  %v983_v6 = vld [vmem:[%s4397_s2 + $0xa0] sm:$0xff]  ;;  %v986_v60 = vld [vmem:[%s4397_s2 + $0xb8] sm:$0xff] }
 0x16e   : > { %v2800_v51 = vpop.eup %2799  ;;  %v953_v11 = vmul.f32 0.5, %v921_v61  ;;  %v866_v59 = vmul.f32 0.5, %v832_v3  ;;  %2594 = vmatpush1.bf16.msra.mxu1 %v2593_v50  ;;  %v985_v12 = vld [vmem:[%s4397_s2 + $0xb0] sm:$0xff]  ;;  %v988_v22 = vld [vmem:[%s4397_s2 + $0xc8] sm:$0xff]  ;;  %v987_v21 = vld [vmem:[%s4397_s2 + $0xc0] sm:$0xff] }
 0x16f   : > { %v2802_v63 = vpop.eup %2801  ;;  %v924_v14 = vadd.f32 1.0, %v2800_v51  ;;  %v865_v16 = vmul.f32 0.5, %v827_v7  ;;  %2595 = vmatprep.subr.bf16.mxu1 %v3042_v54  ;;  %1088 = vperm.xlu0 %2737, %v3258_v32   ;;  %v990_v61 = vld [vmem:[%s4397_s2 + $0xd8] sm:$0xff]  ;;  %v989_v3 = vld [vmem:[%s4397_s2 + $0xd0] sm:$0xff]  ;;  %v992_v29 = vld [vmem:[%s4397_s2 + $0xe8] sm:$0xff] }
 0x170   : > { %v923_v25 = vadd.f32 1.0, %v2802_v63  ;;  %2811 = vtanh.f32 %v866_v59  ;;  %v2596_v43 = vpack.c.bf16 %v954_v20, %v953_v11  ;;  %v991_v50 = vld [vmem:[%s4397_s2 + $0xe0] sm:$0xff]  ;;  %v994_v20 = vld [vmem:[%s4397_s2 + $0xf8] sm:$0xff]  ;;  %v993_v7 = vld [vmem:[%s4397_s2 + $0xf0] sm:$0xff] }
 0x171   : > { %v956_v8 = vmul.f32 0.5, %v924_v14  ;;  %2813 = vtanh.f32 %v865_v16  ;;  %1084 = vperm.xlu1 %2738, %v3253_v31   ;;  %v996_v51 = vld [vmem:[%s4397_s2 + $0x108] sm:$0xff]  ;;  %v995_v11 = vld [vmem:[%s4397_s2 + $0x100] sm:$0xff]  ;;  %v998_v59 = vld [vmem:[%s4397_s2 + $0x118] sm:$0xff] }
 0x172   : > { %v2804_v15 = vpop.eup %2803  ;;  %v955_v24 = vmul.f32 0.5, %v923_v25  ;;  %2597 = vmatpush1.bf16.msra.mxu1 %v2596_v43  ;;  %v997_v63 = vld [vmem:[%s4397_s2 + $0x110] sm:$0xff]  ;;  %v1000_v14 = vld [vmem:[%s4397_s2 + $0x128] sm:$0xff]  ;;  %v999_v16 = vld [vmem:[%s4397_s2 + $0x120] sm:$0xff] }
 0x173   : > { %v2806_v62 = vpop.eup %2805  ;;  %v926_v33 = vadd.f32 1.0, %v2804_v15  ;;  %2598 = vmatprep.subr.bf16.mxu1 %v3042_v54  ;;  %1096 = vperm.xlu0 %2737, %v3272_v35   ;;  %v1002_v25 = vld [vmem:[%s4397_s2 + $0x138] sm:$0xff]  ;;  %v1001_v43 = vld [vmem:[%s4397_s2 + $0x130] sm:$0xff]  ;;  %v1003_v15 = vld [vmem:[%s4397_s2 + $0x140] sm:$0xff] }
 0x174   : > { %v925_v13 = vadd.f32 1.0, %v2806_v62  ;;  %v2599_v2 = vpack.c.bf16 %v956_v8, %v955_v24  ;;  %v1004_v8 = vld [vmem:[%s4397_s2 + $0x148] sm:$0xff]  ;;  %v1006_v24 = vld [vmem:[%s4397_s2 + $0x158] sm:$0xff]  ;;  %v1005_v62 = vld [vmem:[%s4397_s2 + $0x150] sm:$0xff] }
 0x175   : > { %v958_v19 = vmul.f32 0.5, %v926_v33  ;;  %1092 = vperm.xlu1 %2738, %v3265_v34   ;;  %v1008_v33 = vld [vmem:[%s4397_s2 + $0x168] sm:$0xff] }
 0x176   : > { %v2808_v28 = vpop.eup %2807  ;;  %v957_v23 = vmul.f32 0.5, %v925_v13  ;;  %2600 = vmatpush1.bf16.msra.mxu1 %v2599_v2  ;;  %v1007_v13 = vld [vmem:[%s4397_s2 + $0x160] sm:$0xff]  ;;  %v1010_v2 = vld [vmem:[%s4397_s2 + $0x178] sm:$0xff] }
 0x177   : > { %v2810_v40 = vpop.eup %2809  ;;  %v928_v9 = vadd.f32 1.0, %v2808_v28  ;;  %2601 = vmatprep.subr.bf16.mxu1 %v3042_v54  ;;  %1104 = vperm.xlu0 %2737, %v3288_v39   ;;  %v966_v39 = vld [vmem:[%s4397_s2 + $0x18] sm:$0xff]  ;;  %v1012_v28 = vld [vmem:[%s4397_s2 + $0x188] sm:$0xff] }
 0x178   : > { %v927_v27 = vadd.f32 1.0, %v2810_v40  ;;  %v2602_v0 = vpack.c.bf16 %v958_v19, %v957_v23  ;;  %v1009_v19 = vld [vmem:[%s4397_s2 + $0x170] sm:$0xff]  ;;  %v1011_v23 = vld [vmem:[%s4397_s2 + $0x180] sm:$0xff]  ;;  %v1014_v40 = vld [vmem:[%s4397_s2 + $0x198] sm:$0xff] }
 0x179   : > { %v960_v37 = vmul.f32 0.5, %v928_v9  ;;  %1100 = vperm.xlu1 %2738, %v3283_v38   ;;  %v965_v38 = vld [vmem:[%s4397_s2 + $0x10] sm:$0xff] }
 0x17a   : > { %v2812_v32 = vpop.eup %2811  ;;  %v959_v18 = vmul.f32 0.5, %v927_v27  ;;  %2603 = vmatpush1.bf16.msra.mxu1 %v2602_v0  ;;  %v1013_v9 = vld [vmem:[%s4397_s2 + $0x190] sm:$0xff]  ;;  %v1016_v27 = vld [vmem:[%s4397_s2 + $0x1a8] sm:$0xff]  ;;  %v1015_v0 = vld [vmem:[%s4397_s2 + $0x1a0] sm:$0xff] }
 0x17b   : > { %v2814_v5 = vpop.eup %2813  ;;  %v930_v26 = vadd.f32 1.0, %v2812_v32  ;;  %2604 = vmatprep.subr.bf16.mxu1 %v3042_v54  ;;  %1112 = vperm.xlu0 %2737, %v3302_v42   ;;  %v967_v42 = vld [vmem:[%s4397_s2 + $0x20] sm:$0xff]  ;;  %v1017_v32 = vld [vmem:[%s4397_s2 + $0x1b0] sm:$0xff] }
 0x17c   : > { %v929_v31 = vadd.f32 1.0, %v2814_v5  ;;  %v2605_v4 = vpack.c.bf16 %v960_v37, %v959_v18  ;;  %v1018_v37 = vld [vmem:[%s4397_s2 + $0x1b8] sm:$0xff]  ;;  %v1020_v18 = vld [vmem:[%s4397_s2 + $0x1c8] sm:$0xff]  ;;  %v1019_v5 = vld [vmem:[%s4397_s2 + $0x1c0] sm:$0xff] }
 0x17d   : > { %v962_v1 = vmul.f32 0.5, %v930_v26  ;;  %1108 = vperm.xlu1 %2738, %v3295_v41   ;;  %v968_v41 = vld [vmem:[%s4397_s2 + $0x28] sm:$0xff]  ;;  %v1022_v26 = vld [vmem:[%s4397_s2 + $0x1d8] sm:$0xff] }
 0x17e   : > { %v961_v35 = vmul.f32 0.5, %v929_v31  ;;  %2606 = vmatpush1.bf16.msra.mxu1 %v2605_v4  ;;  %v1021_v31 = vld [vmem:[%s4397_s2 + $0x1d0] sm:$0xff]  ;;  %v1024_v4 = vld [vmem:[%s4397_s2 + $0x1e8] sm:$0xff] }
 0x17f   : > { %2607 = vmatprep.subr.bf16.mxu1 %v3042_v54  ;;  %1120 = vperm.xlu0 %2737, %v3318_v46   ;;  %v969_v46 = vld [vmem:[%s4397_s2 + $0x30] sm:$0xff] }
 0x180   : > { %v2608_v34 = vpack.c.bf16 %v962_v1, %v961_v35  ;;  %v1023_v1 = vld [vmem:[%s4397_s2 + $0x1e0] sm:$0xff]  ;;  %v1026_v35 = vld [vmem:[%s4397_s2 + $0x1f8] sm:$0xff] }
 0x181   : > { %1116 = vperm.xlu1 %2738, %v3313_v45   ;;  %v970_v45 = vld [vmem:[%s4397_s2 + $0x38] sm:$0xff] }
 0x182   : > { %2609 = vmatpush1.bf16.msra.mxu1 %v2608_v34  ;;  %v1025_v34 = vld [vmem:[%s4397_s2 + $0x1f0] sm:$0xff] }
 0x183   : > { %2658 = vmatprep.subr.bf16.mxu1 %v3042_v54  ;;  %1128 = vperm.xlu0 %2737, %v3332_v49   ;;  %v971_v49 = vld [vmem:[%s4397_s2 + $0x40] sm:$0xff] }
 0x185   : > { %1220 = vmatmul.mubr.f32.vlgmr.msra.gmra.mrb[0].mxu1 %v963_v30  ;;  %1124 = vperm.xlu1 %2738, %v3325_v48   ;;  %v972_v48 = vld [vmem:[%s4397_s2 + $0x48] sm:$0xff] }
 0x186   : > { %1224 = vmatprep.mubr.f32.mxu1 %v966_v39 }
 0x187   : > { %1136 = vperm.xlu0 %2737, %v3348_v53   ;;  %v973_v53 = vld [vmem:[%s4397_s2 + $0x50] sm:$0xff] }
 0x189   : > { %1225 = vmatmul.mubr.f32.gmra.mrb[2].mxu1 %v965_v38  ;;  %1132 = vperm.xlu1 %2738, %v3343_v52   ;;  %v974_v52 = vld [vmem:[%s4397_s2 + $0x58] sm:$0xff] }
 0x18a   : > { %1229 = vmatprep.mubr.f32.mxu1 %v968_v41 }
 0x18b   : > { %1144 = vperm.xlu0 %2737, %v3362_v56   ;;  %v975_v56 = vld [vmem:[%s4397_s2 + $0x60] sm:$0xff] }
 0x18d   : > { %1230 = vmatmul.mubr.f32.gmra.mrb[4].mxu1 %v967_v42  ;;  %1140 = vperm.xlu1 %2738, %v3355_v55   ;;  %v976_v55 = vld [vmem:[%s4397_s2 + $0x68] sm:$0xff] }
 0x18e   : > { %1234 = vmatprep.mubr.f32.mxu1 %v970_v45  ;;  %v3044_v45 = vmov 2  }
 0x18f   : > { %1152 = vperm.xlu0 %2737, %v3376_v58   ;;  %v978_v58 = vld [vmem:[%s4397_s2 + $0x78] sm:$0xff] }
 0x191   : > { %1235 = vmatmul.mubr.f32.gmra.mrb[6].mxu1 %v969_v46  ;;  %1148 = vperm.xlu1 %2738, %v3371_v57   ;;  %v977_v57 = vld [vmem:[%s4397_s2 + $0x70] sm:$0xff] }
 0x192   : > { %1239 = vmatprep.mubr.f32.mxu1 %v972_v48  ;;  %v3777_v48 = vld [vmem:[%s4399_s4] sm:$0xff] }
 0x193   : > { %2740 = vset.pattern.permute.xlu0 %v3044_v45 }
 0x195   : > { %1240 = vmatmul.mubr.f32.gmra.mrb[8].mxu1 %v971_v49  ;;  %2739 = vset.pattern.permute.xlu1 %v3044_v45  ;;  %v3783_v49 = vld [vmem:[%s4399_s4 + $0x8] sm:$0xff] }
 0x196   : > { %1244 = vmatprep.mubr.f32.mxu1 %v974_v52  ;;  %1573 = vperm.xlu1 %2739, %v3777_v48  }
 0x197   : > { %1577 = vperm.xlu0 %2740, %v3783_v49  }
 0x199   : > { %1245 = vmatmul.mubr.f32.gmra.mrb[10].mxu1 %v973_v53 }
 0x19a   : > { %1249 = vmatprep.mubr.f32.mxu1 %v976_v55 }
 0x19d   : > { %1250 = vmatmul.mubr.f32.gmra.mrb[12].mxu1 %v975_v56 }
 0x19e   : > { %1254 = vmatprep.mubr.f32.mxu1 %v978_v58 }
 0x1a1   : > { %1255 = vmatmul.mubr.f32.gmra.mrb[14].mxu1 %v977_v57  ;;  %v3789_v57 = vld [vmem:[%s4399_s4 + $0x10] sm:$0xff] }
 0x1a2   : > { %1259 = vmatprep.mubr.f32.mxu1 %v980_v17  ;;  %1581 = vperm.xlu1 %2739, %v3789_v57   ;;  %v3795_v17 = vld [vmem:[%s4399_s4 + $0x20] sm:$0xff] }
 0x1a3   : > { %1589 = vperm.xlu0 %2740, %v3795_v17  }
 0x1a5   : > { %1260 = vmatmul.mubr.f32.gmra.mrb[16].mxu1 %v979_v36 }
 0x1a6   : > { %1264 = vmatprep.mubr.f32.mxu1 %v982_v10 }
 0x1a9   : > { %1265 = vmatmul.mubr.f32.gmra.mrb[18].mxu1 %v981_v44 }
 0x1aa   : > { %1269 = vmatprep.mubr.f32.mxu1 %v984_v47 }
 0x1ad   : > { %1270 = vmatmul.mubr.f32.gmra.mrb[20].mxu1 %v983_v6  ;;  %v3801_v6 = vld [vmem:[%s4399_s4 + $0x18] sm:$0xff] }
 0x1ae   : > { %1274 = vmatprep.mubr.f32.mxu1 %v986_v60  ;;  %1585 = vperm.xlu1 %2739, %v3801_v6   ;;  %v3807_v60 = vld [vmem:[%s4399_s4 + $0x30] sm:$0xff] }
 0x1af   : > { %1597 = vperm.xlu0 %2740, %v3807_v60  }
 0x1b1   : > { %1275 = vmatmul.mubr.f32.gmra.mrb[22].mxu1 %v985_v12 }
 0x1b2   : > { %1279 = vmatprep.mubr.f32.mxu1 %v988_v22 }
 0x1b5   : > { %1280 = vmatmul.mubr.f32.gmra.mrb[24].mxu1 %v987_v21 }
 0x1b6   : > { %1284 = vmatprep.mubr.f32.mxu1 %v990_v61 }
 0x1b9   : > { %1285 = vmatmul.mubr.f32.gmra.mrb[26].mxu1 %v989_v3 }
 0x1ba   : > { %1289 = vmatprep.mubr.f32.mxu1 %v992_v29 }
 0x1bd   : > { %1290 = vmatmul.mubr.f32.gmra.mrb[28].mxu1 %v991_v50  ;;  %v3813_v50 = vld [vmem:[%s4399_s4 + $0x28] sm:$0xff] }
 0x1be   : > { %1294 = vmatprep.mubr.f32.mxu1 %v994_v20  ;;  %1593 = vperm.xlu1 %2739, %v3813_v50   ;;  %v3819_v20 = vld [vmem:[%s4399_s4 + $0x40] sm:$0xff] }
 0x1bf   : > { %1605 = vperm.xlu0 %2740, %v3819_v20  }
 0x1c1   : > { %1295 = vmatmul.mubr.f32.gmra.mrb[30].mxu1 %v993_v7 }
 0x1c2   : > { %1299 = vmatprep.mubr.f32.mxu1 %v996_v51 }
 0x1c5   : > { %1300 = vmatmul.mubr.f32.gmra.mrb[32].mxu1 %v995_v11 }
 0x1c6   : > { %1304 = vmatprep.mubr.f32.mxu1 %v998_v59 }
 0x1c9   : > { %1305 = vmatmul.mubr.f32.gmra.mrb[34].mxu1 %v997_v63 }
 0x1ca   : > { %1309 = vmatprep.mubr.f32.mxu1 %v1000_v14  ;;  %v1509_v14 = vld [vmem:[%s4398_s3 + $0x8] sm:$0xff] }
 0x1cb   : > { %1764 = vmatprep.mubr.f32.mxu0 %v1509_v14 }
 0x1cd   : > { %1310 = vmatmul.mubr.f32.gmra.mrb[36].mxu1 %v999_v16 }
 0x1ce   : > { %1314 = vmatprep.mubr.f32.mxu1 %v1002_v25 }
 0x1d1   : > { %1315 = vmatmul.mubr.f32.gmra.mrb[38].mxu1 %v1001_v43  ;;  %v3828_v43 = vld [vmem:[%s4399_s4 + $0x38] sm:$0xff] }
 0x1d2   : > { %1319 = vmatprep.mubr.f32.mxu1 %v1004_v8  ;;  %v1029_v30 = vpop.permute.xlu0 %1028  ;;  %1601 = vperm.xlu1 %2739, %v3828_v43  }
 0x1d4   : > { %v1033_v38 = vpop.permute.xlu1 %1032 }
 0x1d5   : > { %1320 = vmatmul.mubr.f32.gmra.mrb[40].mxu1 %v1003_v15 }
 0x1d6   : > { %1324 = vmatprep.mubr.f32.mxu1 %v1006_v24  ;;  %v1041_v12 = vpop.permute.xlu0 %1040 }
 0x1d8   : > { %v1037_v56 = vpop.permute.xlu1 %1036 }
 0x1d9   : > { %1325 = vmatmul.mubr.f32.gmra.mrb[42].mxu1 %v1005_v62  ;;  %v3834_v62 = vld [vmem:[%s4399_s4 + $0x50] sm:$0xff] }
 0x1da   : > { %1329 = vmatprep.mubr.f32.mxu1 %v1008_v33  ;;  %v1049_v15 = vpop.permute.xlu0 %1048  ;;  %1613 = vperm.xlu0 %2740, %v3834_v62  }
 0x1dc   : > { %v1045_v7 = vpop.permute.xlu1 %1044 }
 0x1dd   : > { %1330 = vmatmul.mubr.f32.gmra.mrb[44].mxu1 %v1007_v13 }
 0x1de   : > { %1334 = vmatprep.mubr.f32.mxu1 %v1010_v2 }
 0x1e1   : > { %1335 = vmatmul.mubr.f32.gmra.mrb[46].mxu1 %v1009_v19 }
 0x1e2   : > { %1339 = vmatprep.mubr.f32.mxu1 %v1012_v28 }
 0x1e5   : > { %1340 = vmatmul.mubr.f32.gmra.mrb[48].mxu1 %v1011_v23 }
 0x1e6   : > { %1344 = vmatprep.mubr.f32.mxu1 %v1014_v40  ;;  %v3840_v40 = vld [vmem:[%s4399_s4 + $0x48] sm:$0xff] }
 0x1e7   : > { %1609 = vperm.xlu1 %2739, %v3840_v40  }
 0x1e9   : > { %1345 = vmatmul.mubr.f32.gmra.mrb[50].mxu1 %v1013_v9 }
 0x1ea   : > { %1349 = vmatprep.mubr.f32.mxu1 %v1016_v27  ;;  %v1053_v27 = vpop.permute.xlu1 %1052 }
 0x1ed   : > { %1350 = vmatmul.mubr.f32.gmra.mrb[52].mxu1 %v1015_v0 }
 0x1ee   : > { %1354 = vmatprep.mubr.f32.mxu1 %v1018_v37  ;;  %v3846_v37 = vld [vmem:[%s4399_s4 + $0x60] sm:$0xff] }
 0x1ef   : > { %1621 = vperm.xlu0 %2740, %v3846_v37  }
 0x1f1   : > { %1355 = vmatmul.mubr.f32.gmra.mrb[54].mxu1 %v1017_v32 }
 0x1f2   : > { %1359 = vmatprep.mubr.f32.mxu1 %v1020_v18 }
 0x1f5   : > { %1360 = vmatmul.mubr.f32.gmra.mrb[56].mxu1 %v1019_v5 }
 0x1f6   : > { %1364 = vmatprep.mubr.f32.mxu1 %v1022_v26 }
 0x1f9   : > { %1365 = vmatmul.mubr.f32.gmra.mrb[58].mxu1 %v1021_v31 }
 0x1fa   : > { %1369 = vmatprep.mubr.f32.mxu1 %v1024_v4  ;;  %v1557_v4 = vld [vmem:[%s4398_s3 + $0x188] sm:$0xff] }
 0x1fd   : > { %1370 = vmatmul.mubr.f32.gmra.mrb[60].mxu1 %v1023_v1 }
 0x1fe   : > { %1374 = vmatprep.mubr.f32.mxu1 %v1026_v35  ;;  %v1057_v35 = vpop.permute.xlu0 %1056 }
 0x201   : > { %1375 = vmatmul.mubr.f32.gmra.mrb[62].mxu1 %v1025_v34 }
 0x202   : > { %1884 = vmatprep.mubr.f32.mxu1 %v1557_v4 }
 0x258   : > { %v1221_v39 = vpop.f32.mrb[0].mxu1 }
 0x259   : > { %v1222_v41 = vadd.f32 %v1221_v39, %v1029_v30  ;;  %v1223_v42 = vpop.f32.mrb[1].mxu1  ;;  %v3857_v30 = vld [vmem:[%s4399_s4 + $0x58] sm:$0xff] }
 0x25a   : > { %1617 = vperm.xlu1 %2739, %v3857_v30  }
 0x25b   : > { %v1380_v46 = vmul.f32 0.5, %v1222_v41  ;;  %v3863_v41 = vld [vmem:[%s4399_s4 + $0x70] sm:$0xff] }
 0x25c   : > { %v1226_v52 = vpop.f32.mrb[2].mxu1  ;;  %1629 = vperm.xlu0 %2740, %v3863_v41  }
 0x25d   : > { %2815 = vtanh.f32 %v1380_v46  ;;  %v1227_v53 = vadd.f32 %v1226_v52, %v1033_v38  ;;  %v1228_v55 = vpop.f32.mrb[3].mxu1 }
 0x25f   : > { %v1381_v58 = vmul.f32 0.5, %v1227_v53 }
 0x260   : > { %v1231_v36 = vpop.f32.mrb[4].mxu1 }
 0x261   : > { %2817 = vtanh.f32 %v1381_v58  ;;  %v1232_v10 = vadd.f32 %v1231_v36, %v1037_v56  ;;  %v1233_v44 = vpop.f32.mrb[5].mxu1  ;;  %v1061_v56 = vpop.permute.xlu1 %1060  ;;  %v3869_v36 = vld [vmem:[%s4399_s4 + $0x68] sm:$0xff] }
 0x262   : > { %1625 = vperm.xlu1 %2739, %v3869_v36  }
 0x263   : > { %v1382_v47 = vmul.f32 0.5, %v1232_v10 }
 0x264   : > { %v1236_v22 = vpop.f32.mrb[6].mxu1 }
 0x265   : > { %2819 = vtanh.f32 %v1382_v47  ;;  %v1237_v21 = vadd.f32 %v1236_v22, %v1041_v12  ;;  %v1238_v61 = vpop.f32.mrb[7].mxu1  ;;  %v3875_v47 = vld [vmem:[%s4399_s4 + $0x80] sm:$0xff] }
 0x266   : > { %1637 = vperm.xlu0 %2740, %v3875_v47   ;;  %v1065_v61 = vpop.permute.xlu0 %1064 }
 0x267   : > { %v2816_v3 = vpop.eup %2815  ;;  %v1383_v29 = vmul.f32 0.5, %v1237_v21 }
 0x268   : > { %v1241_v51 = vpop.f32.mrb[8].mxu1  ;;  %v1444_v63 = vadd.f32 1.0, %v2816_v3 }
 0x269   : > { %2821 = vtanh.f32 %v1383_v29  ;;  %v1242_v11 = vadd.f32 %v1241_v51, %v1045_v7  ;;  %v1243_v59 = vpop.f32.mrb[9].mxu1  ;;  %v3883_v7 = vld [vmem:[%s4399_s4 + $0x78] sm:$0xff] }
 0x26a   : > { %v1476_v2 = vmul.f32 0.5, %v1444_v63  ;;  %1633 = vperm.xlu1 %2739, %v3883_v7   ;;  %v3889_v59 = vld [vmem:[%s4399_s4 + $0x90] sm:$0xff] }
 0x26b   : > { %v2818_v16 = vpop.eup %2817  ;;  %v1384_v25 = vmul.f32 0.5, %v1242_v11  ;;  %1645 = vperm.xlu0 %2740, %v3889_v59  }
 0x26c   : > { %v1445_v8 = vadd.f32 1.0, %v2818_v16  ;;  %v1246_v24 = vpop.f32.mrb[10].mxu1 }
 0x26d   : > { %2823 = vtanh.f32 %v1384_v25  ;;  %v1247_v33 = vadd.f32 %v1246_v24, %v1049_v15  ;;  %v1248_v13 = vpop.f32.mrb[11].mxu1  ;;  %v1069_v15 = vpop.permute.xlu1 %1068 }
 0x26e   : > { %v1477_v19 = vmul.f32 0.5, %v1445_v8 }
 0x26f   : > { %v2820_v28 = vpop.eup %2819  ;;  %v1385_v23 = vmul.f32 0.5, %v1247_v33  ;;  %v3895_v33 = vld [vmem:[%s4399_s4 + $0x88] sm:$0xff] }
 0x270   : > { %v2611_v9 = vpack.c.bf16 %v1477_v19, %v1476_v2  ;;  %v1251_v0 = vpop.f32.mrb[12].mxu1  ;;  %v1446_v5 = vadd.f32 1.0, %v2820_v28  ;;  %1641 = vperm.xlu1 %2739, %v3895_v33   ;;  %v3901_v19 = vld [vmem:[%s4399_s4 + $0xa0] sm:$0xff] }
 0x271   : > { %2825 = vtanh.f32 %v1385_v23  ;;  %v1252_v32 = vadd.f32 %v1251_v0, %v1053_v27  ;;  %v1253_v18 = vpop.f32.mrb[13].mxu1  ;;  %1653 = vperm.xlu0 %2740, %v3901_v19   ;;  %v1073_v27 = vpop.permute.xlu0 %1072 }
 0x272   : > { %2612 = vmatpush1.bf16.msra.mxu0 %v2611_v9  ;;  %2674 = vmatpush1.bf16.msra.mxu1 %v2611_v9  ;;  %v1478_v42 = vmul.f32 0.5, %v1446_v5  ;;  %v3909_v18 = vld [vmem:[%s4399_s4 + $0x98] sm:$0xff] }
 0x273   : > { %v2822_v26 = vpop.eup %2821  ;;  %v1386_v31 = vmul.f32 0.5, %v1252_v32  ;;  %2613 = vmatprep.subr.bf16.mxu0 %v3042_v54  ;;  %2659 = vmatprep.subr.bf16.mxu1 %v3042_v54 }
 0x274   : > { %v1447_v1 = vadd.f32 1.0, %v2822_v26  ;;  %v1256_v34 = vpop.f32.mrb[14].mxu1  ;;  %1649 = vperm.xlu1 %2739, %v3909_v18  }
 0x275   : > { %2827 = vtanh.f32 %v1386_v31  ;;  %v1257_v39 = vadd.f32 %v1256_v34, %v1057_v35  ;;  %v1258_v38 = vpop.f32.mrb[15].mxu1  ;;  %v3915_v31 = vld [vmem:[%s4399_s4 + $0xb0] sm:$0xff] }
 0x276   : > { %v1479_v46 = vmul.f32 0.5, %v1447_v1  ;;  %1661 = vperm.xlu0 %2740, %v3915_v31  }
 0x277   : > { %v2824_v52 = vpop.eup %2823  ;;  %v1387_v53 = vmul.f32 0.5, %v1257_v39  ;;  %v1077_v39 = vpop.permute.xlu1 %1076 }
 0x278   : > { %v2614_v55 = vpack.c.bf16 %v1479_v46, %v1478_v42  ;;  %v1261_v58 = vpop.f32.mrb[16].mxu1  ;;  %v1448_v12 = vadd.f32 1.0, %v2824_v52  ;;  %v3921_v46 = vld [vmem:[%s4399_s4 + $0xa8] sm:$0xff] }
 0x279   : > { %2829 = vtanh.f32 %v1387_v53  ;;  %v1262_v10 = vadd.f32 %v1261_v58, %v1061_v56  ;;  %v1263_v44 = vpop.f32.mrb[17].mxu1  ;;  %1657 = vperm.xlu1 %2739, %v3921_v46  }
 0x27a   : > { %2615 = vmatpush1.bf16.msra.mxu0 %v2614_v55  ;;  %2675 = vmatpush1.bf16.msra.mxu1 %v2614_v55  ;;  %v1480_v63 = vmul.f32 0.5, %v1448_v12  ;;  %v3927_v55 = vld [vmem:[%s4399_s4 + $0xc0] sm:$0xff]  ;;  %v1081_v44 = vpop.permute.xlu0 %1080 }
 0x27b   : > { %v2826_v22 = vpop.eup %2825  ;;  %v1388_v21 = vmul.f32 0.5, %v1262_v10  ;;  %2616 = vmatprep.subr.bf16.mxu0 %v3042_v54  ;;  %2660 = vmatprep.subr.bf16.mxu1 %v3042_v54 }
 0x27c   : > { %v1449_v3 = vadd.f32 1.0, %v2826_v22  ;;  %v1266_v29 = vpop.f32.mrb[18].mxu1  ;;  %1669 = vperm.xlu0 %2740, %v3927_v55  }
 0x27d   : > { %2831 = vtanh.f32 %v1388_v21  ;;  %v1267_v51 = vadd.f32 %v1266_v29, %v1065_v61  ;;  %v1268_v11 = vpop.f32.mrb[19].mxu1  ;;  %v3935_v21 = vld [vmem:[%s4399_s4 + $0xb8] sm:$0xff]  ;;  %v3941_v29 = vld [vmem:[%s4399_s4 + $0xc8] sm:$0xff] }
 0x27e   : > { %v1481_v14 = vmul.f32 0.5, %v1449_v3  ;;  %1665 = vperm.xlu1 %2739, %v3935_v21  }
 0x27f   : > { %v2828_v16 = vpop.eup %2827  ;;  %v1389_v25 = vmul.f32 0.5, %v1267_v51 }
 0x280   : > { %v2617_v8 = vpack.c.bf16 %v1481_v14, %v1480_v63  ;;  %v1271_v24 = vpop.f32.mrb[20].mxu1  ;;  %v1450_v28 = vadd.f32 1.0, %v2828_v16  ;;  %1673 = vperm.xlu0 %2740, %v3941_v29   ;;  %v1085_v16 = vpop.permute.xlu1 %1084 }
 0x281   : > { %2833 = vtanh.f32 %v1389_v25  ;;  %v1272_v13 = vadd.f32 %v1271_v24, %v1069_v15  ;;  %v1273_v2 = vpop.f32.mrb[21].mxu1  ;;  %v3045_v15 = vmov 3  }
 0x282   : > { %2618 = vmatpush1.bf16.msra.mxu0 %v2617_v8  ;;  %2676 = vmatpush1.bf16.msra.mxu1 %v2617_v8  ;;  %v1482_v4 = vmul.f32 0.5, %v1450_v28 }
 0x283   : > { %v2830_v23 = vpop.eup %2829  ;;  %v1390_v9 = vmul.f32 0.5, %v1272_v13  ;;  %2619 = vmatprep.subr.bf16.mxu0 %v3042_v54  ;;  %2661 = vmatprep.subr.bf16.mxu1 %v3042_v54 }
 0x284   : > { %v1451_v0 = vadd.f32 1.0, %v2830_v23  ;;  %v1276_v32 = vpop.f32.mrb[22].mxu1  ;;  %2741 = vset.pattern.permute.xlu1 %v3045_v15  ;;  %2742 = vset.pattern.permute.xlu0 %v3045_v15 }
 0x285   : > { %2835 = vtanh.f32 %v1390_v9  ;;  %v1277_v5 = vadd.f32 %v1276_v32, %v1073_v27  ;;  %v1278_v26 = vpop.f32.mrb[23].mxu1  ;;  %2054 = vperm.xlu1 %2741, %v3777_v48   ;;  %v1089_v9 = vpop.permute.xlu0 %1088  ;;  %2058 = vperm.xlu0 %2742, %v3783_v49  }
 0x286   : > { %v1483_v1 = vmul.f32 0.5, %v1451_v0 }
 0x287   : > { %v2832_v35 = vpop.eup %2831  ;;  %v1391_v34 = vmul.f32 0.5, %v1277_v5 }
 0x288   : > { %v2620_v38 = vpack.c.bf16 %v1483_v1, %v1482_v4  ;;  %v1281_v42 = vpop.f32.mrb[24].mxu1  ;;  %v1452_v56 = vadd.f32 1.0, %v2832_v35  ;;  %v1093_v35 = vpop.permute.xlu1 %1092 }
 0x289   : > { %2837 = vtanh.f32 %v1391_v34  ;;  %v1282_v52 = vadd.f32 %v1281_v42, %v1077_v39  ;;  %v1283_v53 = vpop.f32.mrb[25].mxu1  ;;  %2062 = vperm.xlu1 %2741, %v3789_v57   ;;  %2070 = vperm.xlu0 %2742, %v3795_v17   ;;  %v1097_v57 = vpop.permute.xlu0 %1096 }
 0x28a   : > { %2621 = vmatpush1.bf16.msra.mxu0 %v2620_v38  ;;  %2677 = vmatpush1.bf16.msra.mxu1 %v2620_v38  ;;  %v1484_v51 = vmul.f32 0.5, %v1452_v56 }
 0x28b   : > { %v2834_v58 = vpop.eup %2833  ;;  %v1392_v10 = vmul.f32 0.5, %v1282_v52  ;;  %2622 = vmatprep.subr.bf16.mxu0 %v3042_v54  ;;  %2662 = vmatprep.subr.bf16.mxu1 %v3042_v54 }
 0x28c   : > { %v1453_v12 = vadd.f32 1.0, %v2834_v58  ;;  %v1286_v22 = vpop.f32.mrb[26].mxu1 }
 0x28d   : > { %2839 = vtanh.f32 %v1392_v10  ;;  %v1287_v61 = vadd.f32 %v1286_v22, %v1081_v44  ;;  %v1288_v3 = vpop.f32.mrb[27].mxu1  ;;  %2066 = vperm.xlu1 %2741, %v3801_v6   ;;  %2078 = vperm.xlu0 %2742, %v3807_v60  }
 0x28e   : > { %v1485_v11 = vmul.f32 0.5, %v1453_v12 }
 0x28f   : > { %v2836_v63 = vpop.eup %2835  ;;  %v1393_v14 = vmul.f32 0.5, %v1287_v61  ;;  %v1101_v61 = vpop.permute.xlu1 %1100 }
 0x290   : > { %v2623_v25 = vpack.c.bf16 %v1485_v11, %v1484_v51  ;;  %v1291_v8 = vpop.f32.mrb[28].mxu1  ;;  %v1454_v2 = vadd.f32 1.0, %v2836_v63 }
 0x291   : > { %2841 = vtanh.f32 %v1393_v14  ;;  %v1292_v24 = vadd.f32 %v1291_v8, %v1085_v16  ;;  %v1293_v13 = vpop.f32.mrb[29].mxu1  ;;  %2074 = vperm.xlu1 %2741, %v3813_v50   ;;  %2086 = vperm.xlu0 %2742, %v3819_v20   ;;  %v1105_v50 = vpop.permute.xlu0 %1104 }
 0x292   : > { %2624 = vmatpush1.bf16.msra.mxu0 %v2623_v25  ;;  %2678 = vmatpush1.bf16.msra.mxu1 %v2623_v25  ;;  %v1486_v48 = vmul.f32 0.5, %v1454_v2 }
 0x293   : > { %v2838_v28 = vpop.eup %2837  ;;  %v1394_v23 = vmul.f32 0.5, %v1292_v24  ;;  %2625 = vmatprep.subr.bf16.mxu0 %v3042_v54  ;;  %2663 = vmatprep.subr.bf16.mxu1 %v3042_v54 }
 0x294   : > { %v1455_v27 = vadd.f32 1.0, %v2838_v28  ;;  %v1296_v0 = vpop.f32.mrb[30].mxu1 }
 0x295   : > { %2843 = vtanh.f32 %v1394_v23  ;;  %v1297_v32 = vadd.f32 %v1296_v0, %v1089_v9  ;;  %v1298_v5 = vpop.f32.mrb[31].mxu1  ;;  %2082 = vperm.xlu1 %2741, %v3828_v43   ;;  %2094 = vperm.xlu0 %2742, %v3834_v62   ;;  %v1109_v23 = vpop.permute.xlu1 %1108 }
 0x296   : > { %v1487_v26 = vmul.f32 0.5, %v1455_v27 }
 0x297   : > { %v2840_v4 = vpop.eup %2839  ;;  %v1395_v1 = vmul.f32 0.5, %v1297_v32 }
 0x298   : > { %v2626_v34 = vpack.c.bf16 %v1487_v26, %v1486_v48  ;;  %v1301_v39 = vpop.f32.mrb[32].mxu1  ;;  %v1456_v49 = vadd.f32 1.0, %v2840_v4 }
 0x299   : > { %2845 = vtanh.f32 %v1395_v1  ;;  %v1302_v38 = vadd.f32 %v1301_v39, %v1093_v35  ;;  %v1303_v42 = vpop.f32.mrb[33].mxu1  ;;  %2090 = vperm.xlu1 %2741, %v3840_v40   ;;  %2102 = vperm.xlu0 %2742, %v3846_v37   ;;  %v1113_v40 = vpop.permute.xlu0 %1112 }
 0x29a   : > { %2627 = vmatpush1.bf16.msra.mxu0 %v2626_v34  ;;  %2679 = vmatpush1.bf16.msra.mxu1 %v2626_v34  ;;  %v1488_v6 = vmul.f32 0.5, %v1456_v49 }
 0x29b   : > { %v2842_v52 = vpop.eup %2841  ;;  %v1396_v53 = vmul.f32 0.5, %v1302_v38  ;;  %2628 = vmatprep.subr.bf16.mxu0 %v3042_v54  ;;  %2664 = vmatprep.subr.bf16.mxu1 %v3042_v54  ;;  %v1117_v38 = vpop.permute.xlu1 %1116 }
 0x29c   : > { %v1457_v56 = vadd.f32 1.0, %v2842_v52  ;;  %v1306_v58 = vpop.f32.mrb[34].mxu1 }
 0x29d   : > { %2847 = vtanh.f32 %v1396_v53  ;;  %v1307_v17 = vadd.f32 %v1306_v58, %v1097_v57  ;;  %v1308_v10 = vpop.f32.mrb[35].mxu1  ;;  %2098 = vperm.xlu1 %2741, %v3857_v30   ;;  %2110 = vperm.xlu0 %2742, %v3863_v41  }
 0x29e   : > { %v1489_v44 = vmul.f32 0.5, %v1457_v56 }
 0x29f   : > { %v2844_v12 = vpop.eup %2843  ;;  %v1397_v22 = vmul.f32 0.5, %v1307_v17 }
 0x2a0   : > { %v2629_v3 = vpack.c.bf16 %v1489_v44, %v1488_v6  ;;  %v1311_v51 = vpop.f32.mrb[36].mxu1  ;;  %v1458_v60 = vadd.f32 1.0, %v2844_v12 }
 0x2a1   : > { %2849 = vtanh.f32 %v1397_v22  ;;  %v1312_v11 = vadd.f32 %v1311_v51, %v1101_v61  ;;  %v1313_v63 = vpop.f32.mrb[37].mxu1  ;;  %2106 = vperm.xlu1 %2741, %v3869_v36   ;;  %2122 = vperm.xlu0 %2742, %v3895_v33   ;;  %v1121_v36 = vpop.permute.xlu0 %1120 }
 0x2a2   : > { %2630 = vmatpush1.bf16.msra.mxu0 %v2629_v3  ;;  %2680 = vmatpush1.bf16.msra.mxu1 %v2629_v3  ;;  %v1490_v43 = vmul.f32 0.5, %v1458_v60  ;;  %v1125_v22 = vpop.permute.xlu1 %1124 }
 0x2a3   : > { %v2846_v14 = vpop.eup %2845  ;;  %v1398_v16 = vmul.f32 0.5, %v1312_v11  ;;  %2631 = vmatprep.subr.bf16.mxu0 %v3042_v54  ;;  %2665 = vmatprep.subr.bf16.mxu1 %v3042_v54 }
 0x2a4   : > { %v1459_v25 = vadd.f32 1.0, %v2846_v14  ;;  %v1316_v8 = vpop.f32.mrb[38].mxu1 }
 0x2a5   : > { %2851 = vtanh.f32 %v1398_v16  ;;  %v1317_v20 = vadd.f32 %v1316_v8, %v1105_v50  ;;  %v1318_v24 = vpop.f32.mrb[39].mxu1  ;;  %2114 = vperm.xlu1 %2741, %v3883_v7   ;;  %2134 = vperm.xlu0 %2742, %v3901_v19   ;;  %v3980_v19 = vld [vmem:[%s4399_s4 + $0xe0] sm:$0xff]  ;;  %v1129_v14 = vpop.permute.xlu0 %1128 }
 0x2a6   : > { %v1491_v13 = vmul.f32 0.5, %v1459_v25  ;;  %v3988_v25 = vld [vmem:[%s4399_s4 + $0xd0] sm:$0xff]  ;;  %v3994_v24 = vld [vmem:[%s4399_s4 + $0xf8] sm:$0xff] }
 0x2a7   : > { %v2848_v2 = vpop.eup %2847  ;;  %v1399_v28 = vmul.f32 0.5, %v1317_v20 }
 0x2a8   : > { %v2632_v9 = vpack.c.bf16 %v1491_v13, %v1490_v43  ;;  %v1321_v27 = vpop.f32.mrb[40].mxu1  ;;  %v1460_v62 = vadd.f32 1.0, %v2848_v2 }
 0x2a9   : > { %2853 = vtanh.f32 %v1399_v28  ;;  %v1322_v0 = vadd.f32 %v1321_v27, %v1109_v23  ;;  %v1323_v32 = vpop.f32.mrb[41].mxu1  ;;  %2118 = vperm.xlu1 %2741, %v3875_v47   ;;  %2746 = vset.pattern.permute.xlu0 %v3044_v45  ;;  %v1133_v23 = vpop.permute.xlu1 %1132 }
 0x2aa   : > { %2633 = vmatpush1.bf16.msra.mxu0 %v2632_v9  ;;  %2681 = vmatpush1.bf16.msra.mxu1 %v2632_v9  ;;  %v1492_v30 = vmul.f32 0.5, %v1460_v62 }
 0x2ab   : > { %v2850_v5 = vpop.eup %2849  ;;  %v1400_v48 = vmul.f32 0.5, %v1322_v0  ;;  %2634 = vmatprep.subr.bf16.mxu0 %v3042_v54  ;;  %2666 = vmatprep.subr.bf16.mxu1 %v3042_v54  ;;  %v2974_v0 = vld [vmem:[%s4399_s4 + $0xd8] sm:$0xff] }
 0x2ac   : > { %v1461_v26 = vadd.f32 1.0, %v2850_v5  ;;  %v1326_v4 = vpop.f32.mrb[42].mxu1  ;;  %1685 = vperm.xlu0 %2746, %v3980_v19  }
 0x2ad   : > { %2855 = vtanh.f32 %v1400_v48  ;;  %v1327_v37 = vadd.f32 %v1326_v4, %v1113_v40  ;;  %v1328_v1 = vpop.f32.mrb[43].mxu1  ;;  %2743 = vset.pattern.permute.xlu1 %v3044_v45 }
 0x2ae   : > { %v1493_v35 = vmul.f32 0.5, %v1461_v26  ;;  %1677 = vperm.xlu1 %2743, %v3988_v25   ;;  %v1137_v26 = vpop.permute.xlu0 %1136 }
 0x2af   : > { %v2852_v34 = vpop.eup %2851  ;;  %v1401_v39 = vmul.f32 0.5, %v1327_v37 }
 0x2b0   : > { %v2635_v42 = vpack.c.bf16 %v1493_v35, %v1492_v30  ;;  %v1331_v49 = vpop.f32.mrb[44].mxu1  ;;  %v1462_v41 = vadd.f32 1.0, %v2852_v34  ;;  %1697 = vperm.xlu0 %2746, %v3994_v24  }
 0x2b1   : > { %2857 = vtanh.f32 %v1401_v39  ;;  %v1332_v52 = vadd.f32 %v1331_v49, %v1117_v38  ;;  %v1333_v53 = vpop.f32.mrb[45].mxu1 }
 0x2b2   : > { %2636 = vmatpush1.bf16.msra.mxu0 %v2635_v42  ;;  %2682 = vmatpush1.bf16.msra.mxu1 %v2635_v42  ;;  %v1494_v7 = vmul.f32 0.5, %v1462_v41  ;;  %v1141_v42 = vpop.permute.xlu1 %1140 }
 0x2b3   : > { %v2854_v57 = vpop.eup %2853  ;;  %v1402_v56 = vmul.f32 0.5, %v1332_v52  ;;  %2637 = vmatprep.subr.bf16.mxu0 %v3042_v54  ;;  %2667 = vmatprep.subr.bf16.mxu1 %v3042_v54 }
 0x2b4   : > { %v1463_v58 = vadd.f32 1.0, %v2854_v57  ;;  %v1336_v17 = vpop.f32.mrb[46].mxu1  ;;  %1681 = vperm.xlu1 %2743, %v2974_v0   ;;  %2748 = vset.pattern.permute.xlu0 %v3045_v15 }
 0x2b5   : > { %2859 = vtanh.f32 %v1402_v56  ;;  %v1337_v33 = vadd.f32 %v1336_v17, %v1121_v36  ;;  %v1338_v10 = vpop.f32.mrb[47].mxu1  ;;  %2150 = vperm.xlu0 %2748, %v3927_v55   ;;  %v2975_v17 = vld [vmem:[%s4399_s4 + $0xe8] sm:$0xff] }
 0x2b6   : > { %v1495_v6 = vmul.f32 0.5, %v1463_v58 }
 0x2b7   : > { %v2856_v44 = vpop.eup %2855  ;;  %v1403_v12 = vmul.f32 0.5, %v1337_v33 }
 0x2b8   : > { %v2638_v61 = vpack.c.bf16 %v1495_v6, %v1494_v7  ;;  %v1341_v3 = vpop.f32.mrb[48].mxu1  ;;  %v1464_v47 = vadd.f32 1.0, %v2856_v44  ;;  %2744 = vset.pattern.permute.xlu1 %v3045_v15 }
 0x2b9   : > { %2861 = vtanh.f32 %v1403_v12  ;;  %v1342_v51 = vadd.f32 %v1341_v3, %v1125_v22  ;;  %v1343_v11 = vpop.f32.mrb[49].mxu1  ;;  %2126 = vperm.xlu1 %2744, %v3889_v59   ;;  %2162 = vperm.xlu0 %2748, %v2974_v0   ;;  %v1145_v59 = vpop.permute.xlu0 %1144 }
 0x2ba   : > { %2639 = vmatpush1.bf16.msra.mxu0 %v2638_v61  ;;  %2683 = vmatpush1.bf16.msra.mxu1 %v2638_v61  ;;  %v1496_v43 = vmul.f32 0.5, %v1464_v47  ;;  %v1149_v12 = vpop.permute.xlu1 %1148 }
 0x2bb   : > { %v2858_v63 = vpop.eup %2857  ;;  %v1404_v60 = vmul.f32 0.5, %v1342_v51  ;;  %2640 = vmatprep.subr.bf16.mxu0 %v3042_v54  ;;  %2668 = vmatprep.subr.bf16.mxu1 %v3042_v54 }
 0x2bc   : > { %v1465_v16 = vadd.f32 1.0, %v2858_v63  ;;  %v1346_v50 = vpop.f32.mrb[50].mxu1 }
 0x2bd   : > { %2863 = vtanh.f32 %v1404_v60  ;;  %v1347_v8 = vadd.f32 %v1346_v50, %v1129_v14  ;;  %v1348_v20 = vpop.f32.mrb[51].mxu1  ;;  %2130 = vperm.xlu1 %2744, %v3909_v18   ;;  %2170 = vperm.xlu0 %2748, %v2975_v17  }
 0x2be   : > { %v1497_v13 = vmul.f32 0.5, %v1465_v16  ;;  %v2976_v16 = vld [vmem:[%s4399_s4 + $0xf0] sm:$0xff] }
 0x2bf   : > { %v2860_v2 = vpop.eup %2859  ;;  %v1405_v28 = vmul.f32 0.5, %v1347_v8 }
 0x2c0   : > { %v2641_v9 = vpack.c.bf16 %v1497_v13, %v1496_v43  ;;  %v1351_v27 = vpop.f32.mrb[52].mxu1  ;;  %v1466_v5 = vadd.f32 1.0, %v2860_v2 }
 0x2c1   : > { %2865 = vtanh.f32 %v1405_v28  ;;  %v1352_v32 = vadd.f32 %v1351_v27, %v1133_v23  ;;  %v1353_v62 = vpop.f32.mrb[53].mxu1  ;;  %2745 = vset.pattern.permute.xlu1 %v3044_v45  ;;  %2178 = vperm.xlu0 %2748, %v3994_v24   ;;  %v1153_v45 = vpop.permute.xlu0 %1152 }
 0x2c2   : > { %2642 = vmatpush1.bf16.msra.mxu0 %v2641_v9  ;;  %2684 = vmatpush1.bf16.msra.mxu1 %v2641_v9  ;;  %v1498_v35 = vmul.f32 0.5, %v1466_v5 }
 0x2c3   : > { %v2862_v48 = vpop.eup %2861  ;;  %v1406_v40 = vmul.f32 0.5, %v1352_v32  ;;  %2643 = vmatprep.subr.bf16.mxu0 %v3042_v54  ;;  %2669 = vmatprep.subr.bf16.mxu1 %v3042_v54 }
 0x2c4   : > { %v1467_v4 = vadd.f32 1.0, %v2862_v48  ;;  %v1356_v37 = vpop.f32.mrb[54].mxu1  ;;  %1689 = vperm.xlu1 %2745, %v2975_v17   ;;  %v1568_v17 = vld [vmem:[%s4398_s3 + $0x1e0] sm:$0xff] }
 0x2c5   : > { %2867 = vtanh.f32 %v1406_v40  ;;  %v1357_v1 = vadd.f32 %v1356_v37, %v1137_v26  ;;  %v1358_v30 = vpop.f32.mrb[55].mxu1  ;;  %v1556_v26 = vld [vmem:[%s4398_s3 + $0x180] sm:$0xff]  ;;  %v1513_v37 = vld [vmem:[%s4398_s3 + $0x28] sm:$0xff] }
 0x2c6   : > { %v1499_v34 = vmul.f32 0.5, %v1467_v4  ;;  %v1558_v4 = vld [vmem:[%s4398_s3 + $0x190] sm:$0xff]  ;;  %v1512_v30 = vld [vmem:[%s4398_s3 + $0x20] sm:$0xff] }
 0x2c7   : > { %v2864_v39 = vpop.eup %2863  ;;  %v1407_v38 = vmul.f32 0.5, %v1357_v1  ;;  %v1561_v1 = vld [vmem:[%s4398_s3 + $0x1a8] sm:$0xff] }
 0x2c8   : > { %v2644_v49 = vpack.c.bf16 %v1499_v34, %v1498_v35  ;;  %v1361_v52 = vpop.f32.mrb[56].mxu1  ;;  %v1468_v57 = vadd.f32 1.0, %v2864_v39  ;;  %1693 = vperm.xlu1 %2745, %v2976_v16   ;;  %v1560_v35 = vld [vmem:[%s4398_s3 + $0x1a0] sm:$0xff]  ;;  %v1515_v34 = vld [vmem:[%s4398_s3 + $0x38] sm:$0xff]  ;;  %v1514_v39 = vld [vmem:[%s4398_s3 + $0x30] sm:$0xff] }
 0x2c9   : > { %2869 = vtanh.f32 %v1407_v38  ;;  %v1362_v53 = vadd.f32 %v1361_v52, %v1141_v42  ;;  %v1363_v41 = vpop.f32.mrb[57].mxu1  ;;  %v1562_v38 = vld [vmem:[%s4398_s3 + $0x1b0] sm:$0xff]  ;;  %v1517_v42 = vld [vmem:[%s4398_s3 + $0x48] sm:$0xff]  ;;  %v1516_v52 = vld [vmem:[%s4398_s3 + $0x40] sm:$0xff] }
 0x2ca   : > { %2645 = vmatpush1.bf16.msra.mxu0 %v2644_v49  ;;  %2685 = vmatpush1.bf16.msra.mxu1 %v2644_v49  ;;  %v1500_v10 = vmul.f32 0.5, %v1468_v57  ;;  %v1565_v49 = vld [vmem:[%s4398_s3 + $0x1c8] sm:$0xff]  ;;  %v1519_v41 = vld [vmem:[%s4398_s3 + $0x58] sm:$0xff] }
 0x2cb   : > { %v2866_v55 = vpop.eup %2865  ;;  %v1408_v56 = vmul.f32 0.5, %v1362_v53  ;;  %2646 = vmatprep.subr.bf16.mxu0 %v3042_v54  ;;  %2670 = vmatprep.subr.bf16.mxu1 %v3042_v54  ;;  %v1564_v53 = vld [vmem:[%s4398_s3 + $0x1c0] sm:$0xff]  ;;  %v1567_v57 = vld [vmem:[%s4398_s3 + $0x1d8] sm:$0xff] }
 0x2cc   : > { %v1469_v36 = vadd.f32 1.0, %v2866_v55  ;;  %v1366_v58 = vpop.f32.mrb[58].mxu1  ;;  %2747 = vset.pattern.permute.xlu1 %v3045_v15  ;;  %v1518_v55 = vld [vmem:[%s4398_s3 + $0x50] sm:$0xff] }
 0x2cd   : > { %2871 = vtanh.f32 %v1408_v56  ;;  %v1367_v33 = vadd.f32 %v1366_v58, %v1145_v59  ;;  %v1368_v18 = vpop.f32.mrb[59].mxu1  ;;  %2138 = vperm.xlu1 %2747, %v3921_v46   ;;  %v1566_v56 = vld [vmem:[%s4398_s3 + $0x1d0] sm:$0xff]  ;;  %v1521_v59 = vld [vmem:[%s4398_s3 + $0x68] sm:$0xff]  ;;  %v1520_v58 = vld [vmem:[%s4398_s3 + $0x60] sm:$0xff] }
 0x2ce   : > { %v1501_v7 = vmul.f32 0.5, %v1469_v36  ;;  %v1569_v36 = vld [vmem:[%s4398_s3 + $0x1e8] sm:$0xff]  ;;  %v1571_v18 = vld [vmem:[%s4398_s3 + $0x1f8] sm:$0xff] }
 0x2cf   : > { %v2868_v6 = vpop.eup %2867  ;;  %v1409_v44 = vmul.f32 0.5, %v1367_v33  ;;  %v1523_v33 = vld [vmem:[%s4398_s3 + $0x78] sm:$0xff] }
 0x2d0   : > { %v2647_v22 = vpack.c.bf16 %v1501_v7, %v1500_v10  ;;  %v1371_v61 = vpop.f32.mrb[60].mxu1  ;;  %v1470_v11 = vadd.f32 1.0, %v2868_v6  ;;  %v1522_v10 = vld [vmem:[%s4398_s3 + $0x70] sm:$0xff]  ;;  %v1525_v6 = vld [vmem:[%s4398_s3 + $0x88] sm:$0xff] }
 0x2d1   : > { %2873 = vtanh.f32 %v1409_v44  ;;  %v1372_v3 = vadd.f32 %v1371_v61, %v1149_v12  ;;  %v1373_v51 = vpop.f32.mrb[61].mxu1  ;;  %2142 = vperm.xlu1 %2747, %v3915_v31   ;;  %v1570_v7 = vld [vmem:[%s4398_s3 + $0x1f0] sm:$0xff]  ;;  %v1524_v44 = vld [vmem:[%s4398_s3 + $0x80] sm:$0xff]  ;;  %v1527_v12 = vld [vmem:[%s4398_s3 + $0x98] sm:$0xff] }
 0x2d2   : > { %2648 = vmatpush1.bf16.msra.mxu0 %v2647_v22  ;;  %2686 = vmatpush1.bf16.msra.mxu1 %v2647_v22  ;;  %v1502_v20 = vmul.f32 0.5, %v1470_v11  ;;  %v1526_v22 = vld [vmem:[%s4398_s3 + $0x90] sm:$0xff]  ;;  %v1529_v61 = vld [vmem:[%s4398_s3 + $0xa8] sm:$0xff]  ;;  %v1531_v51 = vld [vmem:[%s4398_s3 + $0xb8] sm:$0xff] }
 0x2d3   : > { %v2870_v47 = vpop.eup %2869  ;;  %v1410_v63 = vmul.f32 0.5, %v1372_v3  ;;  %2649 = vmatprep.subr.bf16.mxu0 %v3042_v54  ;;  %2671 = vmatprep.subr.bf16.mxu1 %v3042_v54  ;;  %v1528_v3 = vld [vmem:[%s4398_s3 + $0xa0] sm:$0xff]  ;;  %v1530_v11 = vld [vmem:[%s4398_s3 + $0xb0] sm:$0xff] }
 0x2d4   : > { %v1471_v60 = vadd.f32 1.0, %v2870_v47  ;;  %v1376_v14 = vpop.f32.mrb[62].mxu1  ;;  %v1533_v47 = vld [vmem:[%s4398_s3 + $0xc8] sm:$0xff] }
 0x2d5   : > { %2875 = vtanh.f32 %v1410_v63  ;;  %v1377_v50 = vadd.f32 %v1376_v14, %v1153_v45  ;;  %v1378_v8 = vpop.f32.mrb[63].mxu1  ;;  %2146 = vperm.xlu1 %2747, %v3935_v21   ;;  %v1508_v21 = vld [vmem:[%s4398_s3] sm:$0xff]  ;;  %v1535_v45 = vld [vmem:[%s4398_s3 + $0xd8] sm:$0xff]  ;;  %v1537_v14 = vld [vmem:[%s4398_s3 + $0xe8] sm:$0xff] }
 0x2d6   : > { %v1503_v24 = vmul.f32 0.5, %v1471_v60  ;;  %v1532_v63 = vld [vmem:[%s4398_s3 + $0xc0] sm:$0xff]  ;;  %v1534_v60 = vld [vmem:[%s4398_s3 + $0xd0] sm:$0xff] }
 0x2d7   : > { %v2872_v43 = vpop.eup %2871  ;;  %v1411_v13 = vmul.f32 0.5, %v1377_v50  ;;  %v1539_v50 = vld [vmem:[%s4398_s3 + $0xf8] sm:$0xff]  ;;  %v1538_v8 = vld [vmem:[%s4398_s3 + $0xf0] sm:$0xff] }
 0x2d8   : > { %v2650_v2 = vpack.c.bf16 %v1503_v24, %v1502_v20  ;;  %v1472_v28 = vadd.f32 1.0, %v2872_v43  ;;  %v1541_v20 = vld [vmem:[%s4398_s3 + $0x108] sm:$0xff]  ;;  %v1540_v24 = vld [vmem:[%s4398_s3 + $0x100] sm:$0xff]  ;;  %v1543_v43 = vld [vmem:[%s4398_s3 + $0x118] sm:$0xff] }
 0x2d9   : > { %2877 = vtanh.f32 %v1411_v13  ;;  %2154 = vperm.xlu1 %2747, %v3941_v29   ;;  %v1559_v29 = vld [vmem:[%s4398_s3 + $0x198] sm:$0xff]  ;;  %v1542_v13 = vld [vmem:[%s4398_s3 + $0x110] sm:$0xff] }
 0x2da   : > { %2651 = vmatpush1.bf16.msra.mxu0 %v2650_v2  ;;  %2687 = vmatpush1.bf16.msra.mxu1 %v2650_v2  ;;  %v1504_v27 = vmul.f32 0.5, %v1472_v28  ;;  %v1545_v2 = vld [vmem:[%s4398_s3 + $0x128] sm:$0xff]  ;;  %v1544_v28 = vld [vmem:[%s4398_s3 + $0x120] sm:$0xff] }
 0x2db   : > { %v2874_v23 = vpop.eup %2873  ;;  %2652 = vmatprep.subr.bf16.mxu0 %v3042_v54  ;;  %2672 = vmatprep.subr.bf16.mxu1 %v3042_v54 }
 0x2dc   : > { %v1473_v9 = vadd.f32 1.0, %v2874_v23  ;;  %v1547_v23 = vld [vmem:[%s4398_s3 + $0x138] sm:$0xff] }
 0x2dd   : > { %2158 = vperm.xlu1 %2747, %v3988_v25   ;;  %v1510_v25 = vld [vmem:[%s4398_s3 + $0x10] sm:$0xff] }
 0x2de   : > { %v1505_v0 = vmul.f32 0.5, %v1473_v9  ;;  %v1546_v9 = vld [vmem:[%s4398_s3 + $0x130] sm:$0xff] }
 0x2df   : > { %v2876_v32 = vpop.eup %2875 }
 0x2e0   : > { %v2653_v62 = vpack.c.bf16 %v1505_v0, %v1504_v27  ;;  %v1474_v15 = vadd.f32 1.0, %v2876_v32  ;;  %v1549_v27 = vld [vmem:[%s4398_s3 + $0x148] sm:$0xff]  ;;  %v1548_v0 = vld [vmem:[%s4398_s3 + $0x140] sm:$0xff]  ;;  %v1551_v32 = vld [vmem:[%s4398_s3 + $0x158] sm:$0xff] }
 0x2e1   : > { %2166 = vperm.xlu1 %2747, %v3980_v19   ;;  %v1563_v19 = vld [vmem:[%s4398_s3 + $0x1b8] sm:$0xff] }
 0x2e2   : > { %2654 = vmatpush1.bf16.msra.mxu0 %v2653_v62  ;;  %2688 = vmatpush1.bf16.msra.mxu1 %v2653_v62  ;;  %v1506_v48 = vmul.f32 0.5, %v1474_v15  ;;  %v1550_v62 = vld [vmem:[%s4398_s3 + $0x150] sm:$0xff]  ;;  %v1553_v15 = vld [vmem:[%s4398_s3 + $0x168] sm:$0xff] }
 0x2e3   : > { %v2878_v46 = vpop.eup %2877  ;;  %2655 = vmatprep.subr.bf16.mxu0 %v3042_v54  ;;  %2673 = vmatprep.subr.bf16.mxu1 %v3042_v54  ;;  %v1511_v54 = vld [vmem:[%s4398_s3 + $0x18] sm:$0xff] }
 0x2e4   : > { %v1475_v5 = vadd.f32 1.0, %v2878_v46  ;;  %v1552_v46 = vld [vmem:[%s4398_s3 + $0x160] sm:$0xff] }
 0x2e5   : > { %2174 = vperm.xlu1 %2747, %v2976_v16   ;;  %v1536_v16 = vld [vmem:[%s4398_s3 + $0xe0] sm:$0xff] }
 0x2e6   : > { %v1507_v40 = vmul.f32 0.5, %v1475_v5  ;;  %v1555_v5 = vld [vmem:[%s4398_s3 + $0x178] sm:$0xff] }
 0x2e8   : > { %v2656_v31 = vpack.c.bf16 %v1507_v40, %v1506_v48  ;;  %v1554_v48 = vld [vmem:[%s4398_s3 + $0x170] sm:$0xff]  ;;  %v3046_v40 = vmov 4  }
 0x2e9   : > { %2749 = vset.pattern.permute.xlu1 %v3046_v40  ;;  %2750 = vset.pattern.permute.xlu0 %v3046_v40 }
 0x2ea   : > { %2657 = vmatpush1.bf16.msra.mxu0 %v2656_v31  ;;  %2689 = vmatpush1.bf16.msra.mxu1 %v2656_v31  ;;  %v256_v31 = vld [vmem:[%s4399_s4] sm:$0x1] }
 0x2eb   : > { %2252 = vperm.xlu1 %2749, %v256_v31  }
 0x2ed   : > { %1765 = vmatmul.mubr.f32.vlgmr.msra.gmra.mrb[32].mxu0 %v1508_v21  ;;  %1885 = vmatmul.mubr.f32.vlgmr.msra.gmra.mrb[64].mxu1 %v1556_v26  ;;  %v1574_v21 = vpop.permute.xlu1 %1573 }
 0x2ee   : > { %1769 = vmatprep.mubr.f32.mxu0 %v1511_v54  ;;  %1889 = vmatprep.mubr.f32.mxu1 %v1559_v29 }
 0x2f1   : > { %1770 = vmatmul.mubr.f32.gmra.mrb[34].mxu0 %v1510_v25  ;;  %1890 = vmatmul.mubr.f32.gmra.mrb[66].mxu1 %v1558_v4  ;;  %v1582_v26 = vpop.permute.xlu1 %1581 }
 0x2f2   : > { %1774 = vmatprep.mubr.f32.mxu0 %v1513_v37  ;;  %1894 = vmatprep.mubr.f32.mxu1 %v1561_v1  ;;  %v1578_v37 = vpop.permute.xlu0 %1577 }
 0x2f5   : > { %1775 = vmatmul.mubr.f32.gmra.mrb[36].mxu0 %v1512_v30  ;;  %1895 = vmatmul.mubr.f32.gmra.mrb[68].mxu1 %v1560_v35  ;;  %v1586_v54 = vpop.permute.xlu1 %1585 }
 0x2f6   : > { %1779 = vmatprep.mubr.f32.mxu0 %v1515_v34  ;;  %1899 = vmatprep.mubr.f32.mxu1 %v1563_v19  ;;  %v1590_v30 = vpop.permute.xlu0 %1589 }
 0x2f9   : > { %1780 = vmatmul.mubr.f32.gmra.mrb[38].mxu0 %v1514_v39  ;;  %1900 = vmatmul.mubr.f32.gmra.mrb[70].mxu1 %v1562_v38  ;;  %v4219_v29 = vpop.permute.xlu1 %1593 }
 0x2fa   : > { %1784 = vmatprep.mubr.f32.mxu0 %v1517_v42  ;;  %1904 = vmatprep.mubr.f32.mxu1 %v1565_v49  ;;  %v4229_v34 = vpop.permute.xlu0 %1597 }
 0x2fd   : > { %1785 = vmatmul.mubr.f32.gmra.mrb[40].mxu0 %v1516_v52  ;;  %1905 = vmatmul.mubr.f32.gmra.mrb[72].mxu1 %v1564_v53  ;;  %v4221_v25 = vpop.permute.xlu1 %1601 }
 0x2fe   : > { %1789 = vmatprep.mubr.f32.mxu0 %v1519_v41  ;;  %1909 = vmatprep.mubr.f32.mxu1 %v1567_v57  ;;  %v4233_v39 = vpop.permute.xlu0 %1605 }
 0x301   : > { %1790 = vmatmul.mubr.f32.gmra.mrb[42].mxu0 %v1518_v55  ;;  %1910 = vmatmul.mubr.f32.gmra.mrb[74].mxu1 %v1566_v56  ;;  %v4223_v4 = vpop.permute.xlu1 %1609 }
 0x302   : > { %1794 = vmatprep.mubr.f32.mxu0 %v1521_v59  ;;  %1914 = vmatprep.mubr.f32.mxu1 %v1569_v36  ;;  %v4237_v42 = vpop.permute.xlu0 %1613 }
 0x305   : > { %1795 = vmatmul.mubr.f32.gmra.mrb[44].mxu0 %v1520_v58  ;;  %1915 = vmatmul.mubr.f32.gmra.mrb[76].mxu1 %v1568_v17  ;;  %v4225_v1 = vpop.permute.xlu1 %1617 }
 0x306   : > { %1799 = vmatprep.mubr.f32.mxu0 %v1523_v33  ;;  %1919 = vmatprep.mubr.f32.mxu1 %v1571_v18  ;;  %v4241_v52 = vpop.permute.xlu0 %1621 }
 0x309   : > { %1800 = vmatmul.mubr.f32.gmra.mrb[46].mxu0 %v1522_v10  ;;  %1920 = vmatmul.mubr.f32.gmra.mrb[78].mxu1 %v1570_v7  ;;  %v4227_v35 = vpop.permute.xlu1 %1625 }
 0x30a   : > { %1804 = vmatprep.mubr.f32.mxu0 %v1525_v6  ;;  %v4245_v41 = vpop.permute.xlu0 %1629 }
 0x30d   : > { %1805 = vmatmul.mubr.f32.gmra.mrb[48].mxu0 %v1524_v44  ;;  %v4231_v19 = vpop.permute.xlu1 %1633 }
 0x30e   : > { %1809 = vmatprep.mubr.f32.mxu0 %v1527_v12  ;;  %v4249_v55 = vpop.permute.xlu0 %1637 }
 0x311   : > { %1810 = vmatmul.mubr.f32.gmra.mrb[50].mxu0 %v1526_v22  ;;  %v4235_v38 = vpop.permute.xlu1 %1641 }
 0x312   : > { %1814 = vmatprep.mubr.f32.mxu0 %v1529_v61  ;;  %v4251_v59 = vpop.permute.xlu0 %1645 }
 0x315   : > { %1815 = vmatmul.mubr.f32.gmra.mrb[52].mxu0 %v1528_v3  ;;  %v4239_v49 = vpop.permute.xlu1 %1649 }
 0x316   : > { %1819 = vmatprep.mubr.f32.mxu0 %v1531_v51  ;;  %v4255_v58 = vpop.permute.xlu0 %1653 }
 0x319   : > { %1820 = vmatmul.mubr.f32.gmra.mrb[54].mxu0 %v1530_v11  ;;  %v4243_v53 = vpop.permute.xlu1 %1657 }
 0x31a   : > { %1824 = vmatprep.mubr.f32.mxu0 %v1533_v47  ;;  %v4259_v33 = vpop.permute.xlu0 %1661 }
 0x31d   : > { %1825 = vmatmul.mubr.f32.gmra.mrb[56].mxu0 %v1532_v63  ;;  %v4247_v57 = vpop.permute.xlu1 %1665 }
 0x31e   : > { %1829 = vmatprep.mubr.f32.mxu0 %v1535_v45  ;;  %v4267_v63 = vpop.permute.xlu0 %1669 }
 0x321   : > { %1830 = vmatmul.mubr.f32.gmra.mrb[58].mxu0 %v1534_v60  ;;  %v2055_v56 = vpop.permute.xlu1 %2054 }
 0x322   : > { %1834 = vmatprep.mubr.f32.mxu0 %v1537_v14 }
 0x325   : > { %1835 = vmatmul.mubr.f32.gmra.mrb[60].mxu0 %v1536_v16  ;;  %v4253_v36 = vpop.permute.xlu1 %2062 }
 0x326   : > { %1839 = vmatprep.mubr.f32.mxu0 %v1539_v50 }
 0x329   : > { %1840 = vmatmul.mubr.f32.gmra.mrb[62].mxu0 %v1538_v8  ;;  %v4257_v17 = vpop.permute.xlu1 %2066 }
 0x32a   : > { %1844 = vmatprep.mubr.f32.mxu0 %v1541_v20 }
 0x32d   : > { %1845 = vmatmul.mubr.f32.gmra.mrb[64].mxu0 %v1540_v24  ;;  %v4263_v12 = vpop.permute.xlu1 %2074 }
 0x32e   : > { %1849 = vmatprep.mubr.f32.mxu0 %v1543_v43 }
 0x331   : > { %1850 = vmatmul.mubr.f32.gmra.mrb[66].mxu0 %v1542_v13  ;;  %v4271_v20 = vpop.permute.xlu1 %2082 }
 0x332   : > { %1854 = vmatprep.mubr.f32.mxu0 %v1545_v2 }
 0x335   : > { %1855 = vmatmul.mubr.f32.gmra.mrb[68].mxu0 %v1544_v28  ;;  %v4279_v31 = vpop.permute.xlu1 %2090 }
 0x336   : > { %1859 = vmatprep.mubr.f32.mxu0 %v1547_v23 }
 0x339   : > { %1860 = vmatmul.mubr.f32.gmra.mrb[70].mxu0 %v1546_v9 }
 0x33a   : > { %1864 = vmatprep.mubr.f32.mxu0 %v1549_v27  ;;  %v4275_v27 = vpop.permute.xlu0 %1673 }
 0x33d   : > { %1865 = vmatmul.mubr.f32.gmra.mrb[72].mxu0 %v1548_v0 }
 0x33e   : > { %1869 = vmatprep.mubr.f32.mxu0 %v1551_v32 }
 0x341   : > { %1870 = vmatmul.mubr.f32.gmra.mrb[74].mxu0 %v1550_v62 }
 0x342   : > { %1874 = vmatprep.mubr.f32.mxu0 %v1553_v15 }
 0x345   : > { %1875 = vmatmul.mubr.f32.gmra.mrb[76].mxu0 %v1552_v46 }
 0x346   : > { %1879 = vmatprep.mubr.f32.mxu0 %v1555_v5 }
 0x349   : > { %1880 = vmatmul.mubr.f32.gmra.mrb[78].mxu0 %v1554_v48 }
 0x3c0   : > { %v1766_v18 = vpop.f32.mrb[32].mxu0  ;;  %v4261_v10 = vpop.f32.mrb[64].mxu1 }
 0x3c1   : > { %v1767_v7 = vadd.f32 %v1766_v18, %v1574_v21  ;;  %v1768_v6 = vpop.f32.mrb[33].mxu0  ;;  %v1888_v44 = vpop.f32.mrb[65].mxu1 }
 0x3c3   : > { %v1925_v22 = vmul.f32 0.5, %v1767_v7 }
 0x3c4   : > { %v1771_v61 = vpop.f32.mrb[34].mxu0  ;;  %v4265_v3 = vpop.f32.mrb[66].mxu1 }
 0x3c5   : > { %2879 = vtanh.f32 %v1925_v22  ;;  %v1772_v51 = vadd.f32 %v1771_v61, %v1578_v37  ;;  %v1773_v11 = vpop.f32.mrb[35].mxu0  ;;  %v1893_v47 = vpop.f32.mrb[67].mxu1 }
 0x3c7   : > { %v1926_v45 = vmul.f32 0.5, %v1772_v51  ;;  %v2059_v51 = vpop.permute.xlu0 %2058 }
 0x3c8   : > { %v1776_v60 = vpop.f32.mrb[36].mxu0  ;;  %v4269_v14 = vpop.f32.mrb[68].mxu1 }
 0x3c9   : > { %2881 = vtanh.f32 %v1926_v45  ;;  %v1777_v16 = vadd.f32 %v1776_v60, %v1582_v26  ;;  %v1778_v50 = vpop.f32.mrb[37].mxu0  ;;  %v1898_v8 = vpop.f32.mrb[69].mxu1 }
 0x3cb   : > { %v1927_v24 = vmul.f32 0.5, %v1777_v16 }
 0x3cc   : > { %v1781_v43 = vpop.f32.mrb[38].mxu0  ;;  %v4273_v13 = vpop.f32.mrb[70].mxu1 }
 0x3cd   : > { %2883 = vtanh.f32 %v1927_v24  ;;  %v1782_v2 = vadd.f32 %v1781_v43, %v1586_v54  ;;  %v1783_v28 = vpop.f32.mrb[39].mxu0  ;;  %v1903_v23 = vpop.f32.mrb[71].mxu1 }
 0x3ce   : > { %v4287_v28 = vpop.permute.xlu1 %2098 }
 0x3cf   : > { %v2880_v9 = vpop.eup %2879  ;;  %v1928_v0 = vmul.f32 0.5, %v1782_v2 }
 0x3d0   : > { %v1989_v32 = vadd.f32 1.0, %v2880_v9  ;;  %v1786_v62 = vpop.f32.mrb[40].mxu0  ;;  %v4277_v15 = vpop.f32.mrb[72].mxu1 }
 0x3d1   : > { %2885 = vtanh.f32 %v1928_v0  ;;  %v1787_v46 = vadd.f32 %v1786_v62, %v1590_v30  ;;  %v1788_v5 = vpop.f32.mrb[41].mxu0  ;;  %v1908_v48 = vpop.f32.mrb[73].mxu1 }
 0x3d2   : > { %v2021_v26 = vmul.f32 0.5, %v1989_v32 }
 0x3d3   : > { %v2882_v40 = vpop.eup %2881  ;;  %v1929_v21 = vmul.f32 0.5, %v1787_v46 }
 0x3d4   : > { %v1990_v54 = vadd.f32 1.0, %v2882_v40  ;;  %v1791_v37 = vpop.f32.mrb[42].mxu0  ;;  %v4281_v18 = vpop.f32.mrb[74].mxu1  ;;  %v2181_v11 = vmul.f32 %v2055_v56, %v2021_v26 }
 0x3d5   : > { %2887 = vtanh.f32 %v1929_v21  ;;  %v1792_v7 = vadd.f32 %v1791_v37, %v4219_v29  ;;  %v1793_v6 = vpop.f32.mrb[43].mxu0  ;;  %v1913_v44 = vpop.f32.mrb[75].mxu1 }
 0x3d6   : > { %v2022_v22 = vmul.f32 0.5, %v1990_v54 }
 0x3d7   : > { %v2884_v61 = vpop.eup %2883  ;;  %v1930_v30 = vmul.f32 0.5, %v1792_v7 }
 0x3d8   : > { %v2182_v47 = vmul.f32 %v2059_v51, %v2022_v22  ;;  %v1991_v45 = vadd.f32 1.0, %v2884_v61  ;;  %v1796_v60 = vpop.f32.mrb[44].mxu0  ;;  %v4284_v16 = vpop.f32.mrb[76].mxu1 }
 0x3d9   : > { %2889 = vtanh.f32 %v1930_v30  ;;  %v1797_v50 = vadd.f32 %v1796_v60, %v4229_v34  ;;  %v1798_v8 = vpop.f32.mrb[45].mxu0  ;;  %v1918_v24 = vpop.f32.mrb[77].mxu1 }
 0x3da   : > { %v2213_v43 = vadd.f32 %v2182_v47, %v2181_v11  ;;  %v2023_v2 = vmul.f32 0.5, %v1991_v45  ;;  %v4295_v61 = vpop.permute.xlu1 %2106 }
 0x3db   : > { %v2886_v29 = vpop.eup %2885  ;;  %v1931_v23 = vmul.f32 0.5, %v1797_v50 }
 0x3dc   : > { %v2183_v9 = vmul.f32 %v4253_v36, %v2023_v2  ;;  %v1992_v0 = vadd.f32 1.0, %v2886_v29  ;;  %v1801_v56 = vpop.f32.mrb[46].mxu0  ;;  %v4290_v32 = vpop.f32.mrb[78].mxu1 }
 0x3dd   : > { %2891 = vtanh.f32 %v1931_v23  ;;  %v1802_v62 = vadd.f32 %v1801_v56, %v4221_v25  ;;  %v1803_v46 = vpop.f32.mrb[47].mxu0  ;;  %v1923_v5 = vpop.f32.mrb[79].mxu1 }
 0x3de   : > { %v2214_v34 = vadd.f32 %v2213_v43, %v2183_v9  ;;  %v2024_v48 = vmul.f32 0.5, %v1992_v0  ;;  %v2071_v25 = vpop.permute.xlu0 %2070  ;;  %v4299_v29 = vpop.permute.xlu1 %2114 }
 0x3df   : > { %v2888_v40 = vpop.eup %2887  ;;  %v1932_v21 = vmul.f32 0.5, %v1802_v62 }
 0x3e0   : > { %v2184_v26 = vmul.f32 %v4257_v17, %v2024_v48  ;;  %v1993_v54 = vadd.f32 1.0, %v2888_v40  ;;  %v1806_v37 = vpop.f32.mrb[48].mxu0 }
 0x3e1   : > { %2893 = vtanh.f32 %v1932_v21  ;;  %v1807_v36 = vadd.f32 %v1806_v37, %v4233_v39  ;;  %v1808_v7 = vpop.f32.mrb[49].mxu0 }
 0x3e2   : > { %v2215_v6 = vadd.f32 %v2214_v34, %v2184_v26  ;;  %v2025_v44 = vmul.f32 0.5, %v1993_v54  ;;  %v2079_v46 = vpop.permute.xlu0 %2078  ;;  %v4303_v37 = vpop.permute.xlu1 %2118 }
 0x3e3   : > { %v2890_v22 = vpop.eup %2889  ;;  %v1933_v51 = vmul.f32 0.5, %v1807_v36 }
 0x3e4   : > { %v2185_v30 = vmul.f32 %v2071_v25, %v2025_v44  ;;  %v1994_v11 = vadd.f32 1.0, %v2890_v22  ;;  %v1811_v47 = vpop.f32.mrb[50].mxu0 }
 0x3e5   : > { %2895 = vtanh.f32 %v1933_v51  ;;  %v1812_v45 = vadd.f32 %v1811_v47, %v4223_v4  ;;  %v1813_v17 = vpop.f32.mrb[51].mxu0 }
 0x3e6   : > { %v2216_v60 = vadd.f32 %v2215_v6, %v2185_v30  ;;  %v2026_v50 = vmul.f32 0.5, %v1994_v11  ;;  %v2087_v11 = vpop.permute.xlu0 %2086 }
 0x3e7   : > { %v2892_v8 = vpop.eup %2891  ;;  %v1934_v24 = vmul.f32 0.5, %v1812_v45 }
 0x3e8   : > { %v2186_v39 = vmul.f32 %v4263_v12, %v2026_v50  ;;  %v1995_v43 = vadd.f32 1.0, %v2892_v8  ;;  %v1816_v2 = vpop.f32.mrb[52].mxu0 }
 0x3e9   : > { %2897 = vtanh.f32 %v1934_v24  ;;  %v1817_v23 = vadd.f32 %v1816_v2, %v4237_v42  ;;  %v1818_v9 = vpop.f32.mrb[53].mxu0 }
 0x3ea   : > { %v2217_v0 = vadd.f32 %v2216_v60, %v2186_v39  ;;  %v2027_v56 = vmul.f32 0.5, %v1995_v43  ;;  %v4307_v60 = vpop.permute.xlu1 %1677 }
 0x3eb   : > { %v2894_v62 = vpop.eup %2893  ;;  %v1935_v4 = vmul.f32 0.5, %v1817_v23 }
 0x3ec   : > { %v2187_v5 = vmul.f32 %v2079_v46, %v2027_v56  ;;  %v1996_v34 = vadd.f32 1.0, %v2894_v62  ;;  %v1821_v48 = vpop.f32.mrb[54].mxu0 }
 0x3ed   : > { %2899 = vtanh.f32 %v1935_v4  ;;  %v1822_v40 = vadd.f32 %v1821_v48, %v4225_v1  ;;  %v1823_v12 = vpop.f32.mrb[55].mxu0 }
 0x3ee   : > { %v2218_v21 = vadd.f32 %v2217_v0, %v2187_v5  ;;  %v2028_v26 = vmul.f32 0.5, %v1996_v34  ;;  %v4312_v4 = vpop.permute.xlu1 %1681  ;;  %v2095_v5 = vpop.permute.xlu0 %2094 }
 0x3ef   : > { %v2896_v54 = vpop.eup %2895  ;;  %v1936_v36 = vmul.f32 0.5, %v1822_v40 }
 0x3f0   : > { %v2188_v42 = vmul.f32 %v4271_v20, %v2028_v26  ;;  %v1997_v7 = vadd.f32 1.0, %v2896_v54  ;;  %v1826_v6 = vpop.f32.mrb[56].mxu0 }
 0x3f1   : > { %2901 = vtanh.f32 %v1936_v36  ;;  %v1827_v44 = vadd.f32 %v1826_v6, %v4241_v52  ;;  %v1828_v22 = vpop.f32.mrb[57].mxu0 }
 0x3f2   : > { %v2219_v25 = vadd.f32 %v2218_v21, %v2188_v42  ;;  %v2029_v51 = vmul.f32 0.5, %v1997_v7  ;;  %v4316_v6 = vpop.permute.xlu1 %2126 }
 0x3f3   : > { %v2898_v30 = vpop.eup %2897  ;;  %v1937_v1 = vmul.f32 0.5, %v1827_v44 }
 0x3f4   : > { %v2189_v47 = vmul.f32 %v2087_v11, %v2029_v51  ;;  %v1998_v45 = vadd.f32 1.0, %v2898_v30  ;;  %v1831_v17 = vpop.f32.mrb[58].mxu0  ;;  %v2103_v11 = vpop.permute.xlu0 %2102 }
 0x3f5   : > { %2903 = vtanh.f32 %v1937_v1  ;;  %v1832_v50 = vadd.f32 %v1831_v17, %v4227_v35  ;;  %v1833_v20 = vpop.f32.mrb[59].mxu0 }
 0x3f6   : > { %v2220_v8 = vadd.f32 %v2219_v25, %v2189_v47  ;;  %v2030_v24 = vmul.f32 0.5, %v1998_v45 }
 0x3f7   : > { %v2900_v39 = vpop.eup %2899  ;;  %v1938_v43 = vmul.f32 0.5, %v1832_v50 }
 0x3f8   : > { %v2190_v52 = vmul.f32 %v4279_v31, %v2030_v24  ;;  %v1999_v2 = vadd.f32 1.0, %v2900_v39  ;;  %v1836_v23 = vpop.f32.mrb[60].mxu0  ;;  %v4320_v24 = vpop.permute.xlu1 %2130 }
 0x3f9   : > { %2905 = vtanh.f32 %v1938_v43  ;;  %v1837_v9 = vadd.f32 %v1836_v23, %v4245_v41  ;;  %v1838_v0 = vpop.f32.mrb[61].mxu0 }
 0x3fa   : > { %v2221_v56 = vadd.f32 %v2220_v8, %v2190_v52  ;;  %v2031_v62 = vmul.f32 0.5, %v1999_v2 }
 0x3fb   : > { %v2902_v46 = vpop.eup %2901  ;;  %v1939_v35 = vmul.f32 0.5, %v1837_v9  ;;  %v2111_v9 = vpop.permute.xlu0 %2110 }
 0x3fc   : > { %v2191_v34 = vmul.f32 %v2095_v5, %v2031_v62  ;;  %v2000_v48 = vadd.f32 1.0, %v2902_v46  ;;  %v1841_v40 = vpop.f32.mrb[62].mxu0 }
 0x3fd   : > { %2907 = vtanh.f32 %v1939_v35  ;;  %v1842_v12 = vadd.f32 %v1841_v40, %v4231_v19  ;;  %v1843_v31 = vpop.f32.mrb[63].mxu0 }
 0x3fe   : > { %v2222_v21 = vadd.f32 %v2221_v56, %v2191_v34  ;;  %v2032_v26 = vmul.f32 0.5, %v2000_v48  ;;  %v4324_v34 = vpop.permute.xlu1 %1689 }
 0x3ff   : > { %v2904_v54 = vpop.eup %2903  ;;  %v1940_v36 = vmul.f32 0.5, %v1842_v12 }
 0x400   : > { %v2192_v41 = vmul.f32 %v4287_v28, %v2032_v26  ;;  %v2001_v42 = vadd.f32 1.0, %v2904_v54  ;;  %v1846_v7 = vpop.f32.mrb[64].mxu0 }
 0x401   : > { %2909 = vtanh.f32 %v1940_v36  ;;  %v1847_v44 = vadd.f32 %v1846_v7, %v4249_v55  ;;  %v1848_v22 = vpop.f32.mrb[65].mxu0 }
 0x402   : > { %v2223_v25 = vadd.f32 %v2222_v21, %v2192_v41  ;;  %v2033_v51 = vmul.f32 0.5, %v2001_v42 }
 0x403   : > { %v2906_v30 = vpop.eup %2905  ;;  %v1941_v19 = vmul.f32 0.5, %v1847_v44 }
 0x404   : > { %v2193_v1 = vmul.f32 %v2103_v11, %v2033_v51  ;;  %v2002_v47 = vadd.f32 1.0, %v2906_v30  ;;  %v1851_v45 = vpop.f32.mrb[66].mxu0 }
 0x405   : > { %2911 = vtanh.f32 %v1941_v19  ;;  %v1852_v17 = vadd.f32 %v1851_v45, %v4235_v38  ;;  %v1853_v28 = vpop.f32.mrb[67].mxu0 }
 0x406   : > { %v2224_v50 = vadd.f32 %v2223_v25, %v2193_v1  ;;  %v2034_v20 = vmul.f32 0.5, %v2002_v47  ;;  %v1694_v25 = vpop.permute.xlu1 %1693  ;;  %v1892_v28 = vadd.f32 %v4265_v3, %v4275_v27  ;;  %v1902_v3 = vadd.f32 %v4273_v13, %v4312_v4 }
 0x407   : > { %v2908_v8 = vpop.eup %2907  ;;  %v1942_v39 = vmul.f32 0.5, %v1852_v17  ;;  %v1912_v4 = vadd.f32 %v4281_v18, %v4324_v34 }
 0x408   : > { %v2194_v55 = vmul.f32 %v4295_v61, %v2034_v20  ;;  %v2003_v43 = vadd.f32 1.0, %v2908_v8  ;;  %v1856_v52 = vpop.f32.mrb[68].mxu0  ;;  %v1952_v13 = vmul.f32 0.5, %v1902_v3 }
 0x409   : > { %2913 = vtanh.f32 %v1942_v39  ;;  %v1857_v2 = vadd.f32 %v1856_v52, %v4251_v59  ;;  %v1858_v23 = vpop.f32.mrb[69].mxu0  ;;  %v2123_v59 = vpop.permute.xlu0 %2122 }
 0x40a   : > { %v2225_v0 = vadd.f32 %v2224_v50, %v2194_v55  ;;  %v2035_v56 = vmul.f32 0.5, %v2003_v43  ;;  %v1950_v23 = vmul.f32 0.5, %v1892_v28 }
 0x40b   : > { %v2910_v62 = vpop.eup %2909  ;;  %v1943_v38 = vmul.f32 0.5, %v1857_v2 }
 0x40c   : > { %v2195_v46 = vmul.f32 %v2111_v9, %v2035_v56  ;;  %v2004_v5 = vadd.f32 1.0, %v2910_v62  ;;  %v1861_v35 = vpop.f32.mrb[70].mxu0 }
 0x40d   : > { %2915 = vtanh.f32 %v1943_v38  ;;  %v1862_v48 = vadd.f32 %v1861_v35, %v4239_v49  ;;  %v1863_v61 = vpop.f32.mrb[71].mxu0  ;;  %v1887_v49 = vadd.f32 %v4261_v10, %v4267_v63  ;;  %v2135_v47 = vpop.permute.xlu0 %2134  ;;  %v1897_v10 = vadd.f32 %v4269_v14, %v4307_v60 }
 0x40e   : > { %v2226_v40 = vadd.f32 %v2225_v0, %v2195_v46  ;;  %v2036_v12 = vmul.f32 0.5, %v2004_v5 }
 0x40f   : > { %v2912_v31 = vpop.eup %2911  ;;  %v1944_v21 = vmul.f32 0.5, %v1862_v48  ;;  %v1949_v20 = vmul.f32 0.5, %v1887_v49  ;;  %v1951_v56 = vmul.f32 0.5, %v1897_v10 }
 0x410   : > { %v2196_v26 = vmul.f32 %v4299_v29, %v2036_v12  ;;  %v2005_v54 = vadd.f32 1.0, %v2912_v31  ;;  %v1866_v36 = vpop.f32.mrb[72].mxu0 }
 0x411   : > { %2917 = vtanh.f32 %v1944_v21  ;;  %v1867_v41 = vadd.f32 %v1866_v36, %v4255_v58  ;;  %v1868_v42 = vpop.f32.mrb[73].mxu0  ;;  %v1686_v9 = vpop.permute.xlu0 %1685 }
 0x412   : > { %v2227_v7 = vadd.f32 %v2226_v40, %v2196_v26  ;;  %v2037_v44 = vmul.f32 0.5, %v2005_v54  ;;  %v1907_v62 = vadd.f32 %v4277_v15, %v1686_v9  ;;  %v1917_v15 = vadd.f32 %v4284_v16, %v1694_v25 }
 0x413   : > { %v2914_v22 = vpop.eup %2913  ;;  %v1945_v51 = vmul.f32 0.5, %v1867_v41  ;;  %v1954_v26 = vmul.f32 0.5, %v1912_v4 }
 0x414   : > { %v2197_v30 = vmul.f32 %v4303_v37, %v2037_v44  ;;  %v2006_v11 = vadd.f32 1.0, %v2914_v22  ;;  %v1871_v19 = vpop.f32.mrb[74].mxu0  ;;  %v2139_v37 = vpop.permute.xlu1 %2138  ;;  %v1953_v12 = vmul.f32 0.5, %v1907_v62  ;;  %v1955_v34 = vmul.f32 0.5, %v1917_v15 }
 0x415   : > { %2919 = vtanh.f32 %v1945_v51  ;;  %v1872_v29 = vadd.f32 %v1871_v19, %v4243_v53  ;;  %v1873_v1 = vpop.f32.mrb[75].mxu0 }
 0x416   : > { %v2228_v45 = vadd.f32 %v2227_v7, %v2197_v30  ;;  %v2038_v58 = vmul.f32 0.5, %v2006_v11 }
 0x417   : > { %v2916_v17 = vpop.eup %2915  ;;  %v1946_v50 = vmul.f32 0.5, %v1872_v29 }
 0x418   : > { %v2198_v8 = vmul.f32 %v2123_v59, %v2038_v58  ;;  %v2007_v39 = vadd.f32 1.0, %v2916_v17  ;;  %v1876_v63 = vpop.f32.mrb[76].mxu0  ;;  %v2143_v48 = vpop.permute.xlu1 %2142 }
 0x419   : > { %2921 = vtanh.f32 %v1946_v50  ;;  %v1877_v53 = vadd.f32 %v1876_v63, %v4259_v33  ;;  %v1878_v55 = vpop.f32.mrb[77].mxu0 }
 0x41a   : > { %v2229_v43 = vadd.f32 %v2228_v45, %v2198_v8  ;;  %v2039_v52 = vmul.f32 0.5, %v2007_v39  ;;  %2923 = vtanh.f32 %v1949_v20 }
 0x41b   : > { %v2918_v2 = vpop.eup %2917  ;;  %v1947_v27 = vmul.f32 0.5, %v1877_v53 }
 0x41c   : > { %v2199_v0 = vmul.f32 %v4316_v6, %v2039_v52  ;;  %v2008_v14 = vadd.f32 1.0, %v2918_v2  ;;  %v1881_v60 = vpop.f32.mrb[78].mxu0  ;;  %v2147_v18 = vpop.permute.xlu1 %2146 }
 0x41d   : > { %2925 = vtanh.f32 %v1947_v27  ;;  %v1882_v33 = vadd.f32 %v1881_v60, %v4247_v57  ;;  %v1883_v38 = vpop.f32.mrb[79].mxu0  ;;  %v1698_v57 = vpop.permute.xlu0 %1697 }
 0x41e   : > { %v2230_v46 = vadd.f32 %v2229_v43, %v2199_v0  ;;  %v2040_v5 = vmul.f32 0.5, %v2008_v14  ;;  %2927 = vtanh.f32 %v1950_v23  ;;  %v1922_v54 = vadd.f32 %v4290_v32, %v1698_v57 }
 0x41f   : > { %v2920_v35 = vpop.eup %2919  ;;  %v1948_v61 = vmul.f32 0.5, %v1882_v33  ;;  %2929 = vtanh.f32 %v1951_v56 }
 0x420   : > { %v2200_v6 = vmul.f32 %v4320_v24, %v2040_v5  ;;  %v2009_v40 = vadd.f32 1.0, %v2920_v35  ;;  %v1956_v16 = vmul.f32 0.5, %v1922_v54  ;;  %v2155_v29 = vpop.permute.xlu1 %2154 }
 0x421   : > { %2931 = vtanh.f32 %v1948_v61  ;;  %v2151_v39 = vpop.permute.xlu0 %2150 }
 0x422   : > { %v2231_v31 = vadd.f32 %v2230_v46, %v2200_v6  ;;  %v2041_v21 = vmul.f32 0.5, %v2009_v40  ;;  %2933 = vtanh.f32 %v1952_v13 }
 0x423   : > { %v2922_v59 = vpop.eup %2921  ;;  %2935 = vtanh.f32 %v1953_v12 }
 0x424   : > { %v2201_v36 = vmul.f32 %v2135_v47, %v2041_v21  ;;  %v2010_v41 = vadd.f32 1.0, %v2922_v59  ;;  %v2924_v42 = vpop.eup %2923  ;;  %2937 = vtanh.f32 %v1954_v26  ;;  %v2159_v10 = vpop.permute.xlu1 %2158 }
 0x425   : > { %2939 = vtanh.f32 %v1955_v34  ;;  %v2013_v30 = vadd.f32 1.0, %v2924_v42  ;;  %v2163_v27 = vpop.permute.xlu0 %2162 }
 0x426   : > { %v2232_v24 = vadd.f32 %v2231_v31, %v2201_v36  ;;  %v2042_v7 = vmul.f32 0.5, %v2010_v41  ;;  %2941 = vtanh.f32 %v1956_v16 }
 0x427   : > { %v2926_v44 = vpop.eup %2925  ;;  %v2045_v17 = vmul.f32 0.5, %v2013_v30 }
 0x428   : > { %v2202_v22 = vmul.f32 %v2139_v37, %v2042_v7  ;;  %v2011_v25 = vadd.f32 1.0, %v2926_v44  ;;  %v2928_v51 = vpop.eup %2927  ;;  %v2167_v62 = vpop.permute.xlu1 %2166 }
 0x429   : > { %v2930_v49 = vpop.eup %2929  ;;  %v2014_v1 = vadd.f32 1.0, %v2928_v51  ;;  %v2205_v43 = vmul.f32 %v2151_v39, %v2045_v17  ;;  %v2171_v35 = vpop.permute.xlu0 %2170 }
 0x42a   : > { %v2233_v11 = vadd.f32 %v2232_v24, %v2202_v22  ;;  %v2043_v19 = vmul.f32 0.5, %v2011_v25  ;;  %v2015_v20 = vadd.f32 1.0, %v2930_v49 }
 0x42b   : > { %v2932_v32 = vpop.eup %2931  ;;  %v2046_v63 = vmul.f32 0.5, %v2014_v1 }
 0x42c   : > { %v2203_v47 = vmul.f32 %v2143_v48, %v2043_v19  ;;  %v2012_v45 = vadd.f32 1.0, %v2932_v32  ;;  %v2934_v58 = vpop.eup %2933  ;;  %v2047_v52 = vmul.f32 0.5, %v2015_v20  ;;  %v2175_v15 = vpop.permute.xlu1 %2174 }
 0x42d   : > { %v2936_v8 = vpop.eup %2935  ;;  %v2016_v53 = vadd.f32 1.0, %v2934_v58  ;;  %v2206_v9 = vmul.f32 %v2155_v29, %v2046_v63  ;;  %v2179_v59 = vpop.permute.xlu0 %2178 }
 0x42e   : > { %v2234_v28 = vadd.f32 %v2233_v11, %v2203_v47  ;;  %v2044_v50 = vmul.f32 0.5, %v2012_v45  ;;  %v2938_v55 = vpop.eup %2937  ;;  %v2017_v23 = vadd.f32 1.0, %v2936_v8  ;;  %v2207_v33 = vmul.f32 %v2159_v10, %v2047_v52 }
 0x42f   : > { %v2940_v3 = vpop.eup %2939  ;;  %v2048_v56 = vmul.f32 0.5, %v2016_v53  ;;  %v2018_v14 = vadd.f32 1.0, %v2938_v55 }
 0x430   : > { %v2204_v37 = vmul.f32 %v2147_v18, %v2044_v50  ;;  %v2942_v60 = vpop.eup %2941  ;;  %v2049_v46 = vmul.f32 0.5, %v2017_v23  ;;  %v2019_v5 = vadd.f32 1.0, %v2940_v3  ;;  %v2253_v16 = vpop.permute.xlu1 %2252 }
 0x431   : > { %v2208_v13 = vmul.f32 %v2163_v27, %v2048_v56  ;;  %v2050_v4 = vmul.f32 0.5, %v2018_v14  ;;  %v2020_v61 = vadd.f32 1.0, %v2942_v60 }
 0x432   : > { %v2235_v2 = vadd.f32 %v2234_v28, %v2204_v37  ;;  %v2209_v40 = vmul.f32 %v2167_v62, %v2049_v46  ;;  %v2051_v12 = vmul.f32 0.5, %v2019_v5 }
 0x433   : > { %v2210_v31 = vmul.f32 %v2171_v35, %v2050_v4  ;;  %v2052_v21 = vmul.f32 0.5, %v2020_v61 }
 0x434   : > { %v2236_v0 = vadd.f32 %v2235_v2, %v2205_v43  ;;  %v2211_v26 = vmul.f32 %v2175_v15, %v2051_v12 }
 0x435   : > { %v2212_v36 = vmul.f32 %v2179_v59, %v2052_v21 }
 0x436   : > { %v2237_v38 = vadd.f32 %v2236_v0, %v2206_v9 }
 0x438   : > { %v2238_v48 = vadd.f32 %v2237_v38, %v2207_v33 }
 0x43a   : > { %v2239_v6 = vadd.f32 %v2238_v48, %v2208_v13 }
 0x43c   : > { %v2240_v57 = vadd.f32 %v2239_v6, %v2209_v40 }
 0x43e   : > { %v2241_v54 = vadd.f32 %v2240_v57, %v2210_v31 }
 0x440   : > { %v2242_v41 = vadd.f32 %v2241_v54, %v2211_v26 }
 0x442   : > { %v2243_v18 = vadd.f32 %v2242_v41, %v2212_v36 }
 0x444   : > { %v2244_v34 = vrot.slane %v2243_v18, 4 }
 0x446   : > { %v2245_v42 = vadd.f32 %v2244_v34, %v2243_v18 }
 0x448   : > { %v2246_v24 = vrot.slane %v2245_v42, 2 }
 0x44a   : > { %v2247_v7 = vadd.f32 %v2246_v24, %v2245_v42 }
 0x44c   : > { %v2248_v44 = vrot.slane %v2247_v7, 1 }
 0x44e   : > { %v2249_v22 = vadd.f32 %v2248_v44, %v2247_v7 }
 0x450   : > { %v2255_v25 = vadd.f32 %v2253_v16, %v2249_v22 }
 0x452   : > { %v2256_v51 = vmul.f32 0.5, %v2255_v25 }
 0x454   : > { %2943 = vtanh.f32 %v2256_v51 }
 0x45e   : > { %v2944_v49 = vpop.eup %2943 }
 0x45f   : > { %v2258_v30 = vadd.f32 1.0, %v2944_v49 }
 0x461   : > { %v2259_v11 = vmul.f32 0.5, %v2258_v30 }
 0x463   : > { %2260 = vst [vmem:[%s217_s17] sm:$0x1] %v2259_v11 }
 0x464   : > { %2990 = shalt.err (!%p2987_p3)
}
 0x465   : > { %s2991_s30 = scalar_lea.hbm %s4353_s26, 16  ;;  %s2995_s12 = scalar_lea.hbm %s4400_s5, 32 }
 0x466   : > { %p2992_p4 = scmp.ne.s32.totalorder %s4353_s26, %s2991_s30  ;;  %p2996_p9 = scmp.lt.u32.totalorder %s4353_s26, %s4400_s5 }
 0x467   : > { %p2997_p10 = scmp.lt.u32.totalorder %s2995_s12, %s2991_s30  ;;  %p2999_p12 = scmp.lt.u32.totalorder %s2991_s30, %s4353_s26 }
 0x468   : > { %p2993_p7 = pnand %p2992_p4, %p3113_p5 }
 0x469   : > { %p2998_p11 = por %p2997_p10, %p2996_p9 }
 0x46a   : > { %p2994_p8 = pneg %p2993_p7 }
 0x46b   : > { %p3000_p13 = por %p2999_p12, %p2998_p11 }
 0x46d   : > { %p3001_p0 = pnand %p3000_p13, %p2994_p8 }
 0x46f   : > { %3004 = shalt.err (!%p3001_p0)
}
 0x470   : > { %2690 = dma.vmem_to_hbm [thread:$0]  (%p3113_p5), %s4355_s22, 16, %s4353_s26, %s2262_s6  }
 0x471 PF: > { %p2696_p1 = scmp.ge.s32.totalorder %s3039_s21, 2  ;;  %s2286_s15 = sand.u32 1, %s3027_s18  }
 0x472   : > { %s2287_s17 = scalar_lea.sflag [#allocation3], %s2286_s15 }
 0x473   : > { %p2693_p2 = pnand %p2696_p1, %p3117_p6 }
 0x475   : > { %3022 = dma.done.wait (!%p2693_p2), %s2287_s17, 16  }
 0x476   : > { %3024 = vsyncadd (!%p2693_p2), %s2287_s17, 4294967280  ;;  %p15_p3 = scmp.ge.s32.totalorder %s3101_s24, 4   ;;  %s4405_s18 = smov %s3031_s19 }
 0x477   : > { %s4406_s19 = smov %s3035_s20  ;;  %s4407_s20 = smov %s3111_s27 }
 0x478   : > { %s4408_s21 = smov %s3101_s24  ;;  %17 = sbr.rel (!%p15_p3) target bundleno = 3 (0x3), region = 75 }
 0x47f   :  { %2291 = vsyncpa [#allocation3], 1 }
 0x480   :  { %2293 = vsyncpa [#allocation3 + $0x1], 1 }

</bundles_post_ra>
